<compile_context>
chip_gen: v5e
topology: v5e:2x2
jax: 0.10.0
libtpu: 0.0.40
codegen_flags: <defaults>
</compile_context>

<pallas_src>
import jax
import jax.numpy as jnp
from jax.experimental import pallas as pl
from jax.experimental.pallas import tpu as pltpu

EMB = 2048
HID = 512
OUT = 128
T_TEMP = 0.5
INV_T = 1.0 / T_TEMP
BN_EPS = 1e-5
EPS = 1e-8


def target_loss_kernel(x_ref, w1_ref, gamma_ref, beta_ref, w2_ref, b2_ref,
                       tgt_ref, y_ref, out_ref, acc_ref):
    k = pl.program_id(0)

    @pl.when(k == 0)
    def _():
        acc_ref[...] = jnp.zeros_like(acc_ref)

    # Partial x @ W1 for this K tile (bf16 inputs, f32 accumulation on the MXU).
    acc_ref[...] += jnp.dot(x_ref[...], w1_ref[...],
                            preferred_element_type=jnp.float32)

    @pl.when(k == pl.num_programs(0) - 1)
    def _():
        h = acc_ref[...]                                   # (B, HID) f32
        B = h.shape[0]
        C = tgt_ref.shape[0]
        inv_b = 1.0 / B

        # BatchNorm1d (training-mode batch stats). Two-pass variance: mean((h-mu)^2),
        # clamped >= 0, so no catastrophic cancellation before rsqrt. All f32 (v5e VPU).
        mu = jnp.sum(h, axis=0, keepdims=True) * inv_b                      # (1, HID)
        d = h - mu
        var = jnp.maximum(jnp.sum(d * d, axis=0, keepdims=True) * inv_b, 0.0)
        scale = gamma_ref[...] * jax.lax.rsqrt(var + BN_EPS)
        h = jnp.maximum(d * scale + beta_ref[...], 0.0)    # BN + ReLU

        # Linear(512 -> 128, bias=True) on the MXU; 1/T folded into the (B,128) tensor
        # instead of the (B,C) similarity matrix.
        h2 = (jnp.dot(h.astype(jnp.bfloat16), w2_ref[...],
                      preferred_element_type=jnp.float32) + b2_ref[...]) * INV_T

        # Similarity: contract dim 1 of target in its stored (C, OUT) layout (no .T).
        logits = jax.lax.dot_general(
            h2.astype(jnp.bfloat16), tgt_ref[...],
            dimension_numbers=(((1,), (1,)), ((), ())),
            preferred_element_type=jnp.float32)            # (B, C)
        sim = jnp.exp(jnp.clip(logits, -20.0, 20.0))

        # one-hot(y) built in-kernel from a class iota.
        cls_ids = jax.lax.broadcasted_iota(jnp.int32, (B, C), dimension=1)
        one_hot = (cls_ids == y_ref[...]).astype(jnp.float32)

        target_sim = jnp.sum(sim * one_hot, axis=1, keepdims=True)          # (B, 1)
        total_sim = jnp.sum(sim, axis=1, keepdims=True)                     # (B, 1)
        logp = jnp.log((target_sim + EPS) / (total_sim + EPS) + EPS)
        # Scalar loss written straight to SMEM (no masked partial VMEM store / writeback).
        out_ref[0, 0] = -jnp.sum(logp) * inv_b


def target_loss(x, y, target, w1, gamma, beta, w2, b2, *, tk=1024):
    B, emb = x.shape
    hid = w1.shape[1]
    out_dim = w2.shape[1]
    C = target.shape[0]
    tk = min(tk, emb)
    assert emb % tk == 0
    nk = emb // tk

    # bf16 MXU inputs (halves HBM traffic on the dominant W1/x streams); accumulation and
    # all elementwise math stays f32. Documented drift vs. the f32 PyTorch module.
    x_bf = x.astype(jnp.bfloat16)
    w1_bf = w1.astype(jnp.bfloat16)
    w2_bf = w2.astype(jnp.bfloat16)
    tgt_bf = target.astype(jnp.bfloat16)
    y2d = y.astype(jnp.int32).reshape(B, 1)
    gamma2d = gamma.reshape(1, hid).astype(jnp.float32)
    beta2d = beta.reshape(1, hid).astype(jnp.float32)
    b2_2d = b2.reshape(1, out_dim).astype(jnp.float32)

    cost = pl.CostEstimate(
        flops=2 * B * emb * hid + 2 * B * hid * out_dim + 2 * B * out_dim * C,
        transcendentals=B * C + B + hid,
        bytes_accessed=(2 * (x_bf.size + w1_bf.size + w2_bf.size + tgt_bf.size)
                        + 4 * (gamma2d.size + beta2d.size + b2_2d.size + y2d.size) + 4),
    )

    # Explicit VMEM bound: double-buffered x/W1 tiles + resident tensors + f32 accumulator,
    # with 2x headroom, capped under v7x's 64 MiB physical VMEM.
    vmem_need = (2 * (B * tk + tk * hid) * 2            # double-buffered bf16 x / W1 tiles
                 + (hid * out_dim + C * out_dim) * 2    # resident bf16 W2 / target
                 + B * hid * 4                          # f32 x@W1 accumulator
                 + (2 * hid + out_dim + B) * 4)         # gamma / beta / b2 / labels
    vmem_limit = int(min(max(2 * vmem_need, 16 << 20), 64 << 20))

    out = pl.pallas_call(
        target_loss_kernel,
        grid=(nk,),
        in_specs=[
            pl.BlockSpec((B, tk), lambda k: (0, k)),          # x: pipelined K tiles
            pl.BlockSpec((tk, hid), lambda k: (k, 0)),        # w1: pipelined K tiles
            pl.BlockSpec((1, hid), lambda k: (0, 0)),         # gamma (resident)
            pl.BlockSpec((1, hid), lambda k: (0, 0)),         # beta  (resident)
            pl.BlockSpec((hid, out_dim), lambda k: (0, 0)),   # w2    (resident)
            pl.BlockSpec((1, out_dim), lambda k: (0, 0)),     # b2    (resident)
            pl.BlockSpec((C, out_dim), lambda k: (0, 0)),     # target (resident)
            pl.BlockSpec((B, 1), lambda k: (0, 0)),           # labels
        ],
        out_specs=pl.BlockSpec(memory_space=pltpu.MemorySpace.SMEM),
        out_shape=jax.ShapeDtypeStruct((1, 1), jnp.float32),
        scratch_shapes=[pltpu.VMEM((B, hid), jnp.float32)],   # x@W1 f32 accumulator
        compiler_params=pltpu.CompilerParams(
            dimension_semantics=("arbitrary",),
            vmem_limit_bytes=vmem_limit),
        cost_estimate=cost,
    )(x_bf, w1_bf, gamma2d, beta2d, w2_bf, b2_2d, tgt_bf, y2d)
    return out[0, 0]


def target_loss_ref(x, y, target, w1, gamma, beta, w2, b2):
    """Pure-JAX reference mirroring the kernel math (bf16 MXU inputs, f32 accumulation)."""
    B = x.shape[0]
    h = jnp.dot(x.astype(jnp.bfloat16), w1.astype(jnp.bfloat16),
                preferred_element_type=jnp.float32)
    mu = jnp.mean(h, axis=0, keepdims=True)
    var = jnp.mean((h - mu) ** 2, axis=0, keepdims=True)
    scale = gamma.reshape(1, -1) * jax.lax.rsqrt(var + BN_EPS)
    h = jnp.maximum((h - mu) * scale + beta.reshape(1, -1), 0.0)
    h2 = (jnp.dot(h.astype(jnp.bfloat16), w2.astype(jnp.bfloat16),
                  preferred_element_type=jnp.float32) + b2.reshape(1, -1)) * INV_T
    logits = jax.lax.dot_general(
        h2.astype(jnp.bfloat16), target.astype(jnp.bfloat16),
        dimension_numbers=(((1,), (1,)), ((), ())),
        preferred_element_type=jnp.float32)
    sim = jnp.exp(jnp.clip(logits, -20.0, 20.0))
    one_hot = jax.nn.one_hot(y, target.shape[0], dtype=jnp.float32)
    ts = (sim * one_hot).sum(axis=1)
    tot = sim.sum(axis=1)
    return -jnp.sum(jnp.log((ts + EPS) / (tot + EPS) + EPS)) / B


if __name__ == "__main__":
    key = jax.random.PRNGKey(0)
    kx, ky, kt, kw1, kw2, kb2 = jax.random.split(key, 6)

    B = 8       # batch_size
    C = 16      # cls_num

    x = jax.random.normal(kx, (B, EMB), dtype=jnp.float32)
    y = jax.random.randint(ky, (B,), 0, C, dtype=jnp.int32)
    target = jax.random.normal(kt, (C, OUT), dtype=jnp.float32)

    # deterministic synthetic parameters for g (shapes from the module __init__)
    w1 = jax.random.normal(kw1, (EMB, HID), dtype=jnp.float32) * 0.02   # Linear(2048,512).weight.T
    gamma = jnp.ones((HID,), dtype=jnp.float32)                         # BatchNorm1d(512).weight
    beta = jnp.zeros((HID,), dtype=jnp.float32)                         # BatchNorm1d(512).bias
    w2 = jax.random.normal(kw2, (HID, OUT), dtype=jnp.float32) * 0.05   # Linear(512,128).weight.T
    b2 = jax.random.normal(kb2, (OUT,), dtype=jnp.float32) * 0.01       # Linear(512,128).bias

    loss = jax.block_until_ready(target_loss(x, y, target, w1, gamma, beta, w2, b2))
    ref = jax.block_until_ready(target_loss_ref(x, y, target, w1, gamma, beta, w2, b2))

    assert jnp.allclose(loss, ref, rtol=5e-3, atol=5e-3), (loss, ref)
    print("KERNEL_OK")
</pallas_src>

<mosaic_0001>
module attributes {stable_mosaic.version = 11 : i64} {
  func.func @target_loss_kernel(%arg0: i32, %arg1: memref<8x1024xbf16, #tpu.memory_space<vmem>>, %arg2: memref<1024x512xbf16, #tpu.memory_space<vmem>>, %arg3: memref<1x512xf32, #tpu.memory_space<vmem>>, %arg4: memref<1x512xf32, #tpu.memory_space<vmem>>, %arg5: memref<512x128xbf16, #tpu.memory_space<vmem>>, %arg6: memref<1x128xf32, #tpu.memory_space<vmem>>, %arg7: memref<16x128xbf16, #tpu.memory_space<vmem>>, %arg8: memref<8x1xi32, #tpu.memory_space<vmem>>, %arg9: memref<1x1xf32, #tpu.memory_space<smem>>, %arg10: memref<8x512xf32, #tpu.memory_space<vmem>>) attributes {dimension_semantics = [#tpu.dimension_semantics<arbitrary>], iteration_bounds = array<i64: 2>, scalar_prefetch = 0 : i64, scratch_operands = 1 : i64, tpu.core_type = #tpu.core_type<tc>, window_params = [{transform_indices = @transform_0, window_bounds = array<i64: 8, 1024>}, {transform_indices = @transform_1, window_bounds = array<i64: 1024, 512>}, {pipeline_mode = #tpu.pipeline_mode<synchronous>, transform_indices = @transform_2, window_bounds = array<i64: 1, 512>}, {pipeline_mode = #tpu.pipeline_mode<synchronous>, transform_indices = @transform_3, window_bounds = array<i64: 1, 512>}, {pipeline_mode = #tpu.pipeline_mode<synchronous>, transform_indices = @transform_4, window_bounds = array<i64: 512, 128>}, {pipeline_mode = #tpu.pipeline_mode<synchronous>, transform_indices = @transform_5, window_bounds = array<i64: 1, 128>}, {pipeline_mode = #tpu.pipeline_mode<synchronous>, transform_indices = @transform_6, window_bounds = array<i64: 16, 128>}, {pipeline_mode = #tpu.pipeline_mode<synchronous>, transform_indices = @transform_7, window_bounds = array<i64: 8, 1>}, {transform_indices = @transform_8, window_bounds = array<i64: 1, 1>}]} {
    %c0_i32 = arith.constant 0 : i32
    %0 = arith.cmpi eq, %arg0, %c0_i32 : i32
    %1 = arith.extui %0 : i1 to i32
    %c0_i32_0 = arith.constant 0 : i32
    %2 = arith.cmpi ne, %1, %c0_i32_0 : i32
    scf.if %2 {
      %cst_9 = arith.constant 0.000000e+00 : f32
      %12 = vector.broadcast %cst_9 : f32 to vector<8x512xf32>
      %c0_10 = arith.constant 0 : index
      %c0_11 = arith.constant 0 : index
      %13 = vector.load %arg10[%c0_10, %c0_11] : memref<8x512xf32, #tpu.memory_space<vmem>>, vector<8x512xf32>
      tpu.vector_store %arg10[%c0_10, %c0_11], %12 {strides = array<i32>} : memref<8x512xf32, #tpu.memory_space<vmem>>, vector<8x512xf32>,
    } else {
    }
    %c0 = arith.constant 0 : index
    %c0_1 = arith.constant 0 : index
    %3 = vector.load %arg10[%c0, %c0_1] : memref<8x512xf32, #tpu.memory_space<vmem>>, vector<8x512xf32>
    %c0_2 = arith.constant 0 : index
    %c0_3 = arith.constant 0 : index
    %4 = vector.load %arg1[%c0_2, %c0_3] : memref<8x1024xbf16, #tpu.memory_space<vmem>>, vector<8x1024xbf16>
    %c0_4 = arith.constant 0 : index
    %c0_5 = arith.constant 0 : index
    %5 = vector.load %arg2[%c0_4, %c0_5] : memref<1024x512xbf16, #tpu.memory_space<vmem>>, vector<1024x512xbf16>
    %cst = arith.constant dense<0.000000e+00> : vector<8x512xf32>
    %6 = tpu.matmul %4, %5, %cst {dimension_numbers = #tpu.dot_dimension_numbers<[1], [0], [0], [1], [0, 0, 1, 1], [], []>} : vector<8x1024xbf16>, vector<1024x512xbf16>, vector<8x512xf32> -> vector<8x512xf32>
    %7 = arith.addf %3, %6 : vector<8x512xf32>
    %c0_6 = arith.constant 0 : index
    %c0_7 = arith.constant 0 : index
    %8 = vector.load %arg10[%c0_6, %c0_7] : memref<8x512xf32, #tpu.memory_space<vmem>>, vector<8x512xf32>
    tpu.vector_store %arg10[%c0_6, %c0_7], %7 {strides = array<i32>} : memref<8x512xf32, #tpu.memory_space<vmem>>, vector<8x512xf32>,
    %c1_i32 = arith.constant 1 : i32
    %9 = arith.cmpi eq, %arg0, %c1_i32 : i32
    %10 = arith.extui %9 : i1 to i32
    %c0_i32_8 = arith.constant 0 : i32
    %11 = arith.cmpi ne, %10, %c0_i32_8 : i32
    scf.if %11 {
      %c0_9 = arith.constant 0 : index
      %c0_10 = arith.constant 0 : index
      %12 = vector.load %arg10[%c0_9, %c0_10] : memref<8x512xf32, #tpu.memory_space<vmem>>, vector<8x512xf32>
      %cst_11 = arith.constant dense<0.000000e+00> : vector<512xf32>
      %13 = vector.multi_reduction <add>, %12, %cst_11 [0] : vector<8x512xf32> to vector<512xf32>
      %14 = vector.shape_cast %13 : vector<512xf32> to vector<1x512xf32>
      %cst_12 = arith.constant 1.250000e-01 : f32
      %15 = vector.broadcast %cst_12 : f32 to vector<1x512xf32>
      %16 = arith.mulf %14, %15 : vector<1x512xf32>
      %17 = vector.broadcast %16 : vector<1x512xf32> to vector<8x512xf32>
      %18 = arith.subf %12, %17 : vector<8x512xf32>
      %19 = arith.mulf %18, %18 : vector<8x512xf32>
      %cst_13 = arith.constant dense<0.000000e+00> : vector<512xf32>
      %20 = vector.multi_reduction <add>, %19, %cst_13 [0] : vector<8x512xf32> to vector<512xf32>
      %21 = vector.shape_cast %20 : vector<512xf32> to vector<1x512xf32>
      %cst_14 = arith.constant 1.250000e-01 : f32
      %22 = vector.broadcast %cst_14 : f32 to vector<1x512xf32>
      %23 = arith.mulf %21, %22 : vector<1x512xf32>
      %cst_15 = arith.constant 0.000000e+00 : f32
      %24 = vector.broadcast %cst_15 : f32 to vector<1x512xf32>
      %25 = arith.maximumf %23, %24 : vector<1x512xf32>
      %c0_16 = arith.constant 0 : index
      %c0_17 = arith.constant 0 : index
      %26 = vector.load %arg3[%c0_16, %c0_17] : memref<1x512xf32, #tpu.memory_space<vmem>>, vector<1x512xf32>
      %cst_18 = arith.constant 9.99999974E-6 : f32
      %27 = vector.broadcast %cst_18 : f32 to vector<1x512xf32>
      %28 = arith.addf %25, %27 : vector<1x512xf32>
      %29 = math.rsqrt %28 : vector<1x512xf32>
      %30 = arith.mulf %26, %29 : vector<1x512xf32>
      %31 = vector.broadcast %30 : vector<1x512xf32> to vector<8x512xf32>
      %32 = arith.mulf %18, %31 : vector<8x512xf32>
      %c0_19 = arith.constant 0 : index
      %c0_20 = arith.constant 0 : index
      %33 = vector.load %arg4[%c0_19, %c0_20] : memref<1x512xf32, #tpu.memory_space<vmem>>, vector<1x512xf32>
      %34 = vector.broadcast %33 : vector<1x512xf32> to vector<8x512xf32>
      %35 = arith.addf %32, %34 : vector<8x512xf32>
      %cst_21 = arith.constant 0.000000e+00 : f32
      %36 = vector.broadcast %cst_21 : f32 to vector<8x512xf32>
      %37 = arith.maximumf %35, %36 : vector<8x512xf32>
      %38 = arith.truncf %37 : vector<8x512xf32> to vector<8x512xbf16>
      %c0_22 = arith.constant 0 : index
      %c0_23 = arith.constant 0 : index
      %39 = vector.load %arg5[%c0_22, %c0_23] : memref<512x128xbf16, #tpu.memory_space<vmem>>, vector<512x128xbf16>
      %cst_24 = arith.constant dense<0.000000e+00> : vector<8x128xf32>
      %40 = tpu.matmul %38, %39, %cst_24 {dimension_numbers = #tpu.dot_dimension_numbers<[1], [0], [0], [1], [0, 0, 1, 1], [], []>} : vector<8x512xbf16>, vector<512x128xbf16>, vector<8x128xf32> -> vector<8x128xf32>
      %c0_25 = arith.constant 0 : index
      %c0_26 = arith.constant 0 : index
      %41 = vector.load %arg6[%c0_25, %c0_26] : memref<1x128xf32, #tpu.memory_space<vmem>>, vector<1x128xf32>
      %42 = vector.broadcast %41 : vector<1x128xf32> to vector<8x128xf32>
      %43 = arith.addf %40, %42 : vector<8x128xf32>
      %cst_27 = arith.constant 2.000000e+00 : f32
      %44 = vector.broadcast %cst_27 : f32 to vector<8x128xf32>
      %45 = arith.mulf %43, %44 : vector<8x128xf32>
      %46 = arith.truncf %45 : vector<8x128xf32> to vector<8x128xbf16>
      %c0_28 = arith.constant 0 : index
      %c0_29 = arith.constant 0 : index
      %47 = vector.load %arg7[%c0_28, %c0_29] : memref<16x128xbf16, #tpu.memory_space<vmem>>, vector<16x128xbf16>
      %cst_30 = arith.constant dense<0.000000e+00> : vector<8x16xf32>
      %48 = tpu.matmul %46, %47, %cst_30 {dimension_numbers = #tpu.dot_dimension_numbers<[1], [1], [0], [0], [0, 0, 1, 0], [], []>} : vector<8x128xbf16>, vector<16x128xbf16>, vector<8x16xf32> -> vector<8x16xf32>
      %cst_31 = arith.constant -2.000000e+01 : f32
      %cst_32 = arith.constant 2.000000e+01 : f32
      %49 = vector.broadcast %cst_31 : f32 to vector<8x16xf32>
      %50 = arith.maximumf %49, %48 : vector<8x16xf32>
      %51 = vector.broadcast %cst_32 : f32 to vector<8x16xf32>
      %52 = arith.minimumf %51, %50 : vector<8x16xf32>
      %53 = math.exp %52 : vector<8x16xf32>
      %54 = tpu.iota {dimensions = array<i32: 1>} : vector<8x16xi32>
      %c0_33 = arith.constant 0 : index
      %c0_34 = arith.constant 0 : index
      %55 = vector.load %arg8[%c0_33, %c0_34] : memref<8x1xi32, #tpu.memory_space<vmem>>, vector<8x1xi32>
      %56 = vector.broadcast %55 : vector<8x1xi32> to vector<8x16xi32>
      %57 = arith.cmpi eq, %54, %56 : vector<8x16xi32>
      %58 = arith.extui %57 : vector<8x16xi1> to vector<8x16xi32>
      %59 = arith.sitofp %58 : vector<8x16xi32> to vector<8x16xf32>
      %60 = arith.mulf %53, %59 : vector<8x16xf32>
      %cst_35 = arith.constant dense<0.000000e+00> : vector<8xf32>
      %61 = vector.multi_reduction <add>, %60, %cst_35 [1] : vector<8x16xf32> to vector<8xf32>
      %62 = vector.shape_cast %61 : vector<8xf32> to vector<8x1xf32>
      %cst_36 = arith.constant dense<0.000000e+00> : vector<8xf32>
      %63 = vector.multi_reduction <add>, %53, %cst_36 [1] : vector<8x16xf32> to vector<8xf32>
      %64 = vector.shape_cast %63 : vector<8xf32> to vector<8x1xf32>
      %cst_37 = arith.constant 9.99999993E-9 : f32
      %65 = vector.broadcast %cst_37 : f32 to vector<8x1xf32>
      %66 = arith.addf %62, %65 : vector<8x1xf32>
      %cst_38 = arith.constant 9.99999993E-9 : f32
      %67 = vector.broadcast %cst_38 : f32 to vector<8x1xf32>
      %68 = arith.addf %64, %67 : vector<8x1xf32>
      %69 = arith.divf %66, %68 : vector<8x1xf32>
      %cst_39 = arith.constant 9.99999993E-9 : f32
      %70 = vector.broadcast %cst_39 : f32 to vector<8x1xf32>
      %71 = arith.addf %69, %70 : vector<8x1xf32>
      %72 = math.log %71 : vector<8x1xf32>
      %73 = vector.shape_cast %72 : vector<8x1xf32> to vector<1x8x1xf32>
      %cst_40 = arith.constant dense<0.000000e+00> : vector<1xf32>
      %74 = vector.multi_reduction <add>, %73, %cst_40 [1, 2] : vector<1x8x1xf32> to vector<1xf32>
      %75 = vector.shape_cast %74 : vector<1xf32> to vector<1x1x1xf32>
      %76 = vector.extract %75[0, 0, 0] : f32 from vector<1x1x1xf32>
      %cst_41 = arith.constant 0.000000e+00 : f32
      %77 = arith.subf %cst_41, %76 : f32
      %cst_42 = arith.constant 1.250000e-01 : f32
      %78 = arith.mulf %77, %cst_42 : f32
      %c0_43 = arith.constant 0 : index
      %c0_44 = arith.constant 0 : index
      %79 = memref.load %arg9[%c0_43, %c0_44] : memref<1x1xf32, #tpu.memory_space<smem>>
      memref.store %78, %arg9[%c0_43, %c0_44] : memref<1x1xf32, #tpu.memory_space<smem>>
    } else {
    }
    return
  }
  func.func @transform_0(%arg0: i32) -> (i32, i32) {
    %c0_i32 = arith.constant 0 : i32
    %c0_i32_0 = arith.constant 0 : i32
    return %c0_i32, %arg0 : i32, i32
  }
  func.func @transform_1(%arg0: i32) -> (i32, i32) {
    %c0_i32 = arith.constant 0 : i32
    %c0_i32_0 = arith.constant 0 : i32
    return %arg0, %c0_i32 : i32, i32
  }
  func.func @transform_2(%arg0: i32) -> (i32, i32) {
    %c0_i32 = arith.constant 0 : i32
    %c0_i32_0 = arith.constant 0 : i32
    %c0_i32_1 = arith.constant 0 : i32
    return %c0_i32, %c0_i32_0 : i32, i32
  }
  func.func @transform_3(%arg0: i32) -> (i32, i32) {
    %c0_i32 = arith.constant 0 : i32
    %c0_i32_0 = arith.constant 0 : i32
    %c0_i32_1 = arith.constant 0 : i32
    return %c0_i32, %c0_i32_0 : i32, i32
  }
  func.func @transform_4(%arg0: i32) -> (i32, i32) {
    %c0_i32 = arith.constant 0 : i32
    %c0_i32_0 = arith.constant 0 : i32
    %c0_i32_1 = arith.constant 0 : i32
    return %c0_i32, %c0_i32_0 : i32, i32
  }
  func.func @transform_5(%arg0: i32) -> (i32, i32) {
    %c0_i32 = arith.constant 0 : i32
    %c0_i32_0 = arith.constant 0 : i32
    %c0_i32_1 = arith.constant 0 : i32
    return %c0_i32, %c0_i32_0 : i32, i32
  }
  func.func @transform_6(%arg0: i32) -> (i32, i32) {
    %c0_i32 = arith.constant 0 : i32
    %c0_i32_0 = arith.constant 0 : i32
    %c0_i32_1 = arith.constant 0 : i32
    return %c0_i32, %c0_i32_0 : i32, i32
  }
  func.func @transform_7(%arg0: i32) -> (i32, i32) {
    %c0_i32 = arith.constant 0 : i32
    %c0_i32_0 = arith.constant 0 : i32
    %c0_i32_1 = arith.constant 0 : i32
    return %c0_i32, %c0_i32_0 : i32, i32
  }
  func.func @transform_8(%arg0: i32) -> (i32, i32) {
    %c0_i32 = arith.constant 0 : i32
    %c0_i32_0 = arith.constant 0 : i32
    %c0_i32_1 = arith.constant 0 : i32
    return %c0_i32, %c0_i32_0 : i32, i32
  }
}

</mosaic_0001>

<bundles_post_ra>
// kernel: tpu_custom_call.1
= control target key start
LH: loop header
LB: loop body
LE: loop exit
PB: predicated region body
PF: predicated region fallthrough
CT: control target
= control target key end

     0   :  { %s5848_s0 = inlined_call_operand.hbm [shape: bf16[8,2048], index: 0, kind: input, shape index: {}]   ;;  %s5849_s1 = inlined_call_operand.hbm [shape: bf16[2048,512], index: 1, kind: input, shape index: {}]   ;;  %s5850_s2 = inlined_call_operand.hbm [shape: f32[1,512], index: 2, kind: input, shape index: {}]   ;;  %s5851_s3 = inlined_call_operand.hbm [shape: f32[1,512], index: 3, kind: input, shape index: {}]   ;;  %s5852_s4 = inlined_call_operand.hbm [shape: bf16[512,128], index: 4, kind: input, shape index: {}]   ;;  %s5853_s5 = inlined_call_operand.hbm [shape: f32[1,128], index: 5, kind: input, shape index: {}]   ;;  %s5854_s6 = inlined_call_operand.hbm [shape: bf16[16,128], index: 6, kind: input, shape index: {}]   ;;  %s5855_s7 = inlined_call_operand.vmem [shape: s32[8,1], index: 7, kind: input, shape index: {}]   ;;  %s5856_s8 = inlined_call_operand.hbm [shape: f32[1,1], index: 8, kind: output, shape index: {}]  }
   0x1   :  { %5857 = sst [smem:[#allocation22_spill]] %s5850_s2 }
   0x2   :  { %5858 = sst [smem:[#allocation23_spill]] %s5851_s3 }
   0x3   :  { %5859 = sst [smem:[#allocation24_spill]] %s5852_s4 }
   0x4   :  { %5860 = sst [smem:[#allocation25_spill]] %s5853_s5 }
   0x5   :  { %13 = vsyncpa [#allocation4], 0 }
   0x6   :  { %15 = vsyncpa [#allocation4 + $0x1], 0 }
   0x7   :  { %16 = vsyncpa [#allocation7], 0 }
   0x8   :  { %18 = vsyncpa [#allocation7 + $0x1], 0 }
   0x9   :  { %19 = vsyncpa [#allocation10], 0 }
   0xa   :  { %20 = vsyncpa [#allocation13], 0 }
   0xb   :  { %21 = vsyncpa [#allocation5], 0  ;;  %s5072_s27 = smov 0   ;;  %s5074_s28 = smov 0  }
   0xc   :  { %s5076_s29 = smov 0   ;;  %s5078_s30 = smov 0  }
   0xd LB: > { %s5861_s2 = sld [smem:[#allocation22_spill]]  ;;  %s5096_s12 = sadd.s32 4294967295, %s5012_s30   ;;  %s5012_s30 = sphi %s5078_s30, %s5874_s30   ;;  %s5008_s29 = sphi %s5076_s29, %s5873_s29   ;;  %s5004_s28 = sphi %s5074_s28, %s5872_s28   ;;  %s5000_s27 = sphi %s5072_s27, %s5871_s27  }
   0xe   : > { %p3129_p0 = scmp.ge.s32.totalorder %s5012_s30, 1  ;;  %p48_p1 = scmp.eq.s32.totalorder %s5096_s12, 0 }
   0xf   : > { %p231_p2 = scmp.lt.s32.totalorder %s5012_s30, 3  ;;  %p3130_p3 = scmp.ne.s32.totalorder %s5096_s12, 0 }
  0x10   : > { %s5014_s14 = smov [#allocation8]   ;;  %s5863_s3 = sld [smem:[#allocation23_spill]] }
  0x11   : > { %p5102_p4 = pnand %p3129_p0, %p231_p2  ;;  %s245_s15 = sshll.u32 %s5014_s14, 4  ;;  %s246_s15 = int_to_ptr.vmem [resolvable:$true] %s245_s15 }
  0x12   : > { %s5015_s20 = smov [#allocation9]   ;;  %s5865_s5 = sld [smem:[#allocation25_spill]] }
  0x13   : > { %s243_s11 = sshll.u32 %s5861_s2, 4  ;;  %p4637_p5 = pneg %p5102_p4  ;;  %s244_s11 = int_to_ptr.hbm [resolvable:$true] %s243_s11 }
  0x14   : > { %s257_s21 = sshll.u32 %s5015_s20, 4  ;;  %s5866_s4 = sld [smem:[#allocation24_spill]]  ;;  %s258_s21 = int_to_ptr.vmem [resolvable:$true] %s257_s21 }
  0x15   : > { %p5113_p6 = pnand %p4637_p5, %p48_p1  ;;  %s5016_s10 = smov [#allocation12]  }
  0x16   : > { %s255_s18 = sshll.u32 %s5863_s3, 4  ;;  %s283_s14 = sshll.u32 %s5016_s10, 4  ;;  %s256_s18 = int_to_ptr.hbm [resolvable:$true] %s255_s18  ;;  %s284_s14 = int_to_ptr.vmem [resolvable:$true] %s283_s14 }
  0x17   : > { %4640 = dma.hbm_to_vmem [thread:$0]  (!%p5113_p6), %s244_s11, 64, %s246_s15, [#allocation7]  }
  0x18   : > { %s281_s24 = sshll.u32 %s5865_s5, 4  ;;  %s5017_s16 = smov [#allocation11]   ;;  %s282_s24 = int_to_ptr.hbm [resolvable:$true] %s281_s24 }
  0x19   : > { %4643 = dma.hbm_to_vmem [thread:$0]  (!%p5113_p6), %s256_s18, 64, %s258_s21, [#allocation10]  }
  0x1a   : > { %s266_s9 = sshll.u32 %s5866_s4, 4  ;;  %s268_s11 = sshll.u32 %s5017_s16, 4  ;;  %s267_s9 = int_to_ptr.hbm [resolvable:$true] %s266_s9  ;;  %s269_s11 = int_to_ptr.vmem [resolvable:$true] %s268_s11 }
  0x1b   : > { %4649 = dma.hbm_to_vmem [thread:$0]  (!%p5113_p6), %s282_s24, 16, %s284_s14, [#allocation13]  }
  0x1c   : > { %s5018_s15 = smov 64   ;;  %s5019_s17 = smov 4  }
  0x1d   : > { %4646 = dma.hbm_to_vmem [thread:$0]  (!%p5113_p6), %s267_s9, 4096, %s269_s11, [#allocation10], %s5018_s15, %s5018_s15, %s5019_s17  }
  0x1e   : > { %s292_s21 = sshll.u32 %s5854_s6, 4  ;;  %s5020_s22 = smov [#allocation14]   ;;  %s293_s21 = int_to_ptr.hbm [resolvable:$true] %s292_s21 }
  0x1f   : > { %s294_s23 = sshll.u32 %s5020_s22, 4  ;;  %s5137_s24 = sadd.s32 1, %s5012_s30   ;;  %s295_s23 = int_to_ptr.vmem [resolvable:$true] %s294_s23 }
  0x20   : > { %4652 = dma.hbm_to_vmem [thread:$0]  (!%p5113_p6), %s293_s21, 128, %s295_s23, [#allocation13], %s5018_s15, %s5018_s15, %s5019_s17  }
  0x21   : > { %s31_s25 = ssub.s32 %s5012_s30, %s5137_s24  ;;  %s34_s26 = sadd.s32 1, %s5008_s29 }
  0x22   : > { %p32_p7 = scmp.eq.s32.totalorder %s31_s25, 0  ;;  %p41_p8 = scmp.ne.s32.totalorder %s5008_s29, %s5004_s28 }
  0x23   : > { %p42_p9 = scmp.eq.s32.totalorder %s5012_s30, 0  ;;  %p47_p10 = scmp.ne.s32.totalorder %s5004_s28, %s5000_s27 }
  0x24   : > { %s5148_s9 = scalar_select %p32_p7, %s5008_s29, %s34_s26  }
  0x25   : > { %p43_p11 = por %p42_p9, %p41_p8  ;;  %p5152_p12 = por %p48_p1, %p47_p10 }
  0x26   : > { %p4665_p13 = scmp.lt.s32.totalorder %s5012_s30, 2  ;;  %s311_s19 = sand.u32 1, %s5008_s29  }
  0x27   : > { %s3136_s14 = sshll.u32 %s311_s19, 5  ;;  %s4315_s16 = sshll.u32 %s5012_s30, 5 }
  0x28   : > { %s320_s17 = scalar_lea.hbm %s5848_s0, %s4315_s16  ;;  %s315_s18 = scalar_lea.vmem [#allocation3], %s3136_s14 }
  0x29   : > { %s324_s20 = sshll.u32 %s315_s18, 4  ;;  %s322_s27 = sshll.u32 %s320_s17, 4  ;;  %s325_s20 = int_to_ptr.vmem [resolvable:$true] %s324_s20  ;;  %s323_s27 = int_to_ptr.hbm [resolvable:$true] %s322_s27 }
  0x2a   : > { %p5162_p0 = pnand %p4665_p13, %p43_p11  ;;  %s3139_s22 = sshll.u32 %s311_s19, 11 }
  0x2b   : > { %s331_s23 = sand.u32 1, %s5012_s30   ;;  %s312_s25 = scalar_lea.sflag [#allocation4], %s311_s19 }
  0x2c   : > { %s4884_s26 = sshra.s32 %s323_s27, 4  ;;  %p4888_p5 = pneg %p5162_p0  ;;  %s4885_s26 = int_to_ptr.hbm [resolvable:$true] %s4884_s26 }
  0x2d   : > { %s4886_s2 = scalar_lea.hbm %s4885_s26, 32  ;;  %s4891_s11 = scalar_lea.hbm %s5848_s0, 64 }
  0x2e   : > { %p4887_p2 = scmp.ne.s32.totalorder %s4885_s26, %s4886_s2  ;;  %p4892_p8 = scmp.lt.s32.totalorder %s4885_s26, %s5848_s0 }
  0x2f   : > { %p4893_p9 = scmp.lt.s32.totalorder %s4891_s11, %s4886_s2 }
  0x30   : > { %p4889_p6 = pnand %p4888_p5, %p4887_p2 }
  0x31   : > { %p4894_p10 = por %p4893_p9, %p4892_p8 }
  0x32   : > { %p4890_p7 = pneg %p4889_p6 }
  0x34   : > { %p4895_p11 = pnand %p4894_p10, %p4890_p7 }
  0x36   : > { %4898 = shalt.err (!%p4895_p11)
}
  0x37   : > { %4656 = dma.hbm_to_vmem [thread:$0]  (!%p5162_p0), %s323_s27, 512, %s325_s20, %s312_s25  }
  0x38   : > { %s335_s19 = scalar_lea.vmem [#allocation6], %s3139_s22  ;;  %s4317_s3 = sshll.u32 %s5012_s30, 11 }
  0x39   : > { %s344_s18 = sshll.u32 %s335_s19, 4  ;;  %s341_s16 = scalar_lea.hbm %s5849_s1, %s4317_s3  ;;  %s345_s18 = int_to_ptr.vmem [resolvable:$true] %s344_s18 }
  0x3a   : > { %s342_s5 = sshll.u32 %s341_s16, 4  ;;  %s332_s26 = scalar_lea.sflag [#allocation7], %s331_s23  ;;  %s343_s5 = int_to_ptr.hbm [resolvable:$true] %s342_s5 }
  0x3b   : > { %s4914_s2 = sshra.s32 %s343_s5, 4  ;;  %s4921_s22 = scalar_lea.hbm %s5849_s1, 4096  ;;  %s4915_s2 = int_to_ptr.hbm [resolvable:$true] %s4914_s2 }
  0x3c   : > { %s4916_s11 = scalar_lea.hbm %s4915_s2, 2048  ;;  %p4922_p7 = scmp.lt.s32.totalorder %s4915_s2, %s5849_s1 }
  0x3d   : > { %p4917_p13 = scmp.ne.s32.totalorder %s4915_s2, %s4916_s11  ;;  %p4923_p8 = scmp.lt.s32.totalorder %s4921_s22, %s4916_s11 }
  0x3f   : > { %p4919_p2 = pnand %p4917_p13, %p4888_p5  ;;  %p4924_p9 = por %p4923_p8, %p4922_p7 }
  0x41   : > { %p4920_p6 = pneg %p4919_p2 }
  0x43   : > { %p4925_p10 = pnand %p4924_p9, %p4920_p6 }
  0x45   : > { %4928 = shalt.err (!%p4925_p10)
}
  0x46   : > { %s5021_s3 = smov 256   ;;  %s5022_s4 = smov 16  }
  0x47   : > { %4659 = dma.hbm_to_vmem [thread:$0]  (!%p5162_p0), %s343_s5, 32768, %s345_s18, %s332_s26, %s5021_s3, %s5021_s3, %s5022_s4  }
  0x48   : > { %356 = sbr.rel (%p5102_p4) target bundleno = 1195 (0x4ab), region = 52  ;;  %s358_s23 = sand.u32 (!%p5102_p4), 1, %s5004_s28  }
  0x49   : > { %s3144_s15 = sshll.u32 (!%p5102_p4), %s358_s23, 5  ;;  %s359_s17 = scalar_lea.sflag (!%p5102_p4), [#allocation4], %s358_s23 }
  0x4a   : > { %s5198_s19 = scalar_lea.vmem (!%p5102_p4), [#allocation3], %s3144_s15 }
  0x4d   : > { %4975 = dma.done.wait (%p5152_p12), %s359_s17, 512  }
  0x4e   : > { %4977 = vsyncadd (%p5152_p12), %s359_s17, 4294966784  ;;  %s368_s14 = sand.u32 1, %s5096_s12   ;;  %s3145_s21 = sshll.u32 %s358_s23, 11 }
  0x4f   : > { %s369_s5 = scalar_lea.sflag [#allocation7], %s368_s14  ;;  %s5205_s18 = scalar_lea.vmem [#allocation6], %s3145_s21 }
  0x50   : > { %4979 = dma.done.wait (%p5152_p12), %s369_s5, 32768  }
  0x51   : > { %4981 = vsyncadd (%p5152_p12), %s369_s5, 4294934528 }
  0x52   : > { %4983 = dma.done.wait (%p48_p1), [#allocation7], 64  }
  0x53   : > { %4985 = vsyncadd (%p48_p1), [#allocation7], 4294967232 }
  0x54   : > { %4987 = dma.done.wait (%p48_p1), [#allocation10], 4160  }
  0x55   : > { %4989 = vsyncadd (%p48_p1), [#allocation10], 4294963136 }
  0x56   : > { %4991 = dma.done.wait (%p48_p1), [#allocation13], 144  }
  0x57   : > { %4993 = vsyncadd (%p48_p1), [#allocation13], 4294967152  ;;  %437 = sbr.rel (%p3130_p3) target bundleno = 97 (0x61), region = 84 }
  0x5c   : > { %v5023_v0 = vmov 0.0  }
  0x5d   : > { %438 = vst [vmem:[#allocation2 + $0x10] sm:$0xff] %v5023_v0 }
  0x5e   : > { %439 = vst [vmem:[#allocation2] sm:$0xff] %v5023_v0 }
  0x5f   : > { %440 = vst [vmem:[#allocation2 + $0x18] sm:$0xff] %v5023_v0 }
  0x60   : > { %441 = vst [vmem:[#allocation2 + $0x8] sm:$0xff] %v5023_v0 }
  0x61 PF: > { %v3266_v1 = vld [vmem:[%s5205_s18 + $0xe0] sm:$0xf]  ;;  %v4348_v2 = vld [vmem:[%s5205_s18 + $0xec] sm:$0xf0]  ;;  %p4176_p1 = scmp.ne.s32.totalorder %s5096_s12, 1 }
  0x62   : > { %v3394_v3 = vld [vmem:[%s5205_s18 + $0x1e0] sm:$0xf]  ;;  %v3267_v4 = vor.u32 %v4348_v2, %v3266_v1  ;;  %v4380_v5 = vld [vmem:[%s5205_s18 + $0x1ec] sm:$0xf0] }
  0x63   : > { %v3522_v6 = vld [vmem:[%s5205_s18 + $0x2e0] sm:$0xf]  ;;  %v4412_v7 = vld [vmem:[%s5205_s18 + $0x2ec] sm:$0xf0]  ;;  %v3395_v8 = vor.u32 %v4380_v5, %v3394_v3 }
  0x64   : > { %v3523_v9 = vor.u32 %v4412_v7, %v3522_v6  ;;  %v3650_v10 = vld [vmem:[%s5205_s18 + $0x3e0] sm:$0xf]  ;;  %v4444_v11 = vld [vmem:[%s5205_s18 + $0x3ec] sm:$0xf0]  ;;  %2014 = vmatpush.bf16.msra.mxu0 %v3267_v4 }
  0x65   : > { %v3250_v12 = vld [vmem:[%s5205_s18 + $0xc0] sm:$0xf]  ;;  %v3651_v13 = vor.u32 %v4444_v11, %v3650_v10  ;;  %v4344_v14 = vld [vmem:[%s5205_s18 + $0xcc] sm:$0xf0]  ;;  %2027 = vmatpush.bf16.msra.mxu1 %v3395_v8 }
  0x66   : > { %v3378_v15 = vld [vmem:[%s5205_s18 + $0x1c0] sm:$0xf]  ;;  %v4376_v16 = vld [vmem:[%s5205_s18 + $0x1cc] sm:$0xf0]  ;;  %2040 = vmatpush.bf16.msra.mxu2 %v3523_v9  ;;  %v3251_v17 = vor.u32 %v4344_v14, %v3250_v12 }
  0x67   : > { %v3379_v18 = vor.u32 %v4376_v16, %v3378_v15  ;;  %v3506_v19 = vld [vmem:[%s5205_s18 + $0x2c0] sm:$0xf]  ;;  %v4408_v20 = vld [vmem:[%s5205_s18 + $0x2cc] sm:$0xf0]  ;;  %2053 = vmatpush.bf16.msra.mxu3 %v3651_v13 }
  0x68   : > { %v3634_v21 = vld [vmem:[%s5205_s18 + $0x3c0] sm:$0xf]  ;;  %v3507_v22 = vor.u32 %v4408_v20, %v3506_v19  ;;  %v4440_v23 = vld [vmem:[%s5205_s18 + $0x3cc] sm:$0xf0]  ;;  %2015 = vmatpush.bf16.msra.mxu0 %v3251_v17 }
  0x69   : > { %v3234_v24 = vld [vmem:[%s5205_s18 + $0xa0] sm:$0xf]  ;;  %v4340_v25 = vld [vmem:[%s5205_s18 + $0xac] sm:$0xf0]  ;;  %v3635_v26 = vor.u32 %v4440_v23, %v3634_v21  ;;  %2028 = vmatpush.bf16.msra.mxu1 %v3379_v18 }
  0x6a   : > { %v3362_v27 = vld [vmem:[%s5205_s18 + $0x1a0] sm:$0xf]  ;;  %v4372_v28 = vld [vmem:[%s5205_s18 + $0x1ac] sm:$0xf0]  ;;  %v3235_v30 = vor.u32 %v4340_v25, %v3234_v24  ;;  %2041 = vmatpush.bf16.msra.mxu2 %v3507_v22 }
  0x6b   : > { %v3490_v29 = vld [vmem:[%s5205_s18 + $0x2a0] sm:$0xf]  ;;  %v4404_v31 = vld [vmem:[%s5205_s18 + $0x2ac] sm:$0xf0]  ;;  %v3363_v34 = vor.u32 %v4372_v28, %v3362_v27  ;;  %2054 = vmatpush.bf16.msra.mxu3 %v3635_v26 }
  0x6c   : > { %v3618_v32 = vld [vmem:[%s5205_s18 + $0x3a0] sm:$0xf]  ;;  %v4436_v33 = vld [vmem:[%s5205_s18 + $0x3ac] sm:$0xf0]  ;;  %v3491_v35 = vor.u32 %v4404_v31, %v3490_v29  ;;  %2016 = vmatpush.bf16.msra.mxu0 %v3235_v30 }
  0x6d   : > { %v3218_v36 = vld [vmem:[%s5205_s18 + $0x80] sm:$0xf]  ;;  %v4336_v37 = vld [vmem:[%s5205_s18 + $0x8c] sm:$0xf0]  ;;  %v3619_v39 = vor.u32 %v4436_v33, %v3618_v32  ;;  %2029 = vmatpush.bf16.msra.mxu1 %v3363_v34 }
  0x6e   : > { %v3346_v38 = vld [vmem:[%s5205_s18 + $0x180] sm:$0xf]  ;;  %v4368_v40 = vld [vmem:[%s5205_s18 + $0x18c] sm:$0xf0]  ;;  %v3219_v45 = vor.u32 %v4336_v37, %v3218_v36  ;;  %2042 = vmatpush.bf16.msra.mxu2 %v3491_v35 }
  0x6f   : > { %v3474_v41 = vld [vmem:[%s5205_s18 + $0x280] sm:$0xf]  ;;  %v4400_v42 = vld [vmem:[%s5205_s18 + $0x28c] sm:$0xf0]  ;;  %v3347_v46 = vor.u32 %v4368_v40, %v3346_v38  ;;  %2055 = vmatpush.bf16.msra.mxu3 %v3619_v39 }
  0x70   : > { %v3602_v43 = vld [vmem:[%s5205_s18 + $0x380] sm:$0xf]  ;;  %v4432_v44 = vld [vmem:[%s5205_s18 + $0x38c] sm:$0xf0]  ;;  %v3475_v47 = vor.u32 %v4400_v42, %v3474_v41  ;;  %2017 = vmatpush.bf16.msra.mxu0 %v3219_v45 }
  0x71   : > { %v3202_v48 = vld [vmem:[%s5205_s18 + $0x60] sm:$0xf]  ;;  %v4332_v49 = vld [vmem:[%s5205_s18 + $0x6c] sm:$0xf0]  ;;  %v3603_v51 = vor.u32 %v4432_v44, %v3602_v43  ;;  %2030 = vmatpush.bf16.msra.mxu1 %v3347_v46 }
  0x72   : > { %v3330_v50 = vld [vmem:[%s5205_s18 + $0x160] sm:$0xf]  ;;  %v4364_v52 = vld [vmem:[%s5205_s18 + $0x16c] sm:$0xf0]  ;;  %v3203_v57 = vor.u32 %v4332_v49, %v3202_v48  ;;  %2043 = vmatpush.bf16.msra.mxu2 %v3475_v47 }
  0x73   : > { %v3458_v53 = vld [vmem:[%s5205_s18 + $0x260] sm:$0xf]  ;;  %v4396_v54 = vld [vmem:[%s5205_s18 + $0x26c] sm:$0xf0]  ;;  %v3331_v58 = vor.u32 %v4364_v52, %v3330_v50  ;;  %2056 = vmatpush.bf16.msra.mxu3 %v3603_v51 }
  0x74   : > { %v3586_v55 = vld [vmem:[%s5205_s18 + $0x360] sm:$0xf]  ;;  %v4428_v56 = vld [vmem:[%s5205_s18 + $0x36c] sm:$0xf0]  ;;  %v3459_v59 = vor.u32 %v4396_v54, %v3458_v53  ;;  %2018 = vmatpush.bf16.msra.mxu0 %v3203_v57 }
  0x75   : > { %v3186_v60 = vld [vmem:[%s5205_s18 + $0x40] sm:$0xf]  ;;  %v4328_v61 = vld [vmem:[%s5205_s18 + $0x4c] sm:$0xf0]  ;;  %v3587_v63 = vor.u32 %v4428_v56, %v3586_v55  ;;  %2031 = vmatpush.bf16.msra.mxu1 %v3331_v58 }
  0x76   : > { %v3314_v62 = vld [vmem:[%s5205_s18 + $0x140] sm:$0xf]  ;;  %v4360_v0 = vld [vmem:[%s5205_s18 + $0x14c] sm:$0xf0]  ;;  %v3187_v5 = vor.u32 %v4328_v61, %v3186_v60  ;;  %2044 = vmatpush.bf16.msra.mxu2 %v3459_v59  ;;  %v447_v59 = vld [vmem:[%s5198_s19 + $0x8] sm:$0xff] }
  0x77   : > { %v3442_v1 = vld [vmem:[%s5205_s18 + $0x240] sm:$0xf]  ;;  %v4392_v2 = vld [vmem:[%s5205_s18 + $0x24c] sm:$0xf0]  ;;  %v3315_v6 = vor.u32 %v4360_v0, %v3314_v62  ;;  %2057 = vmatpush.bf16.msra.mxu3 %v3587_v63  ;;  %v712_v0 = vunpack.c.l.b16 %v447_v59 }
  0x78   : > { %v3570_v3 = vld [vmem:[%s5205_s18 + $0x340] sm:$0xf]  ;;  %v4424_v4 = vld [vmem:[%s5205_s18 + $0x34c] sm:$0xf0]  ;;  %v3443_v7 = vor.u32 %v4392_v2, %v3442_v1  ;;  %2019 = vmatpush.bf16.msra.mxu0 %v3187_v5  ;;  %v713_v1 = vunpack.c.h.b16 %v447_v59 }
  0x79   : > { %v3170_v8 = vld [vmem:[%s5205_s18 + $0x20] sm:$0xf]  ;;  %v4324_v9 = vld [vmem:[%s5205_s18 + $0x2c] sm:$0xf0]  ;;  %v3571_v11 = vor.u32 %v4424_v4, %v3570_v3  ;;  %2032 = vmatpush.bf16.msra.mxu1 %v3315_v6  ;;  %v5314_v5 = vpack.c.b16 %v712_v0, %v712_v0 }
  0x7a   : > { %v3298_v10 = vld [vmem:[%s5205_s18 + $0x120] sm:$0xf]  ;;  %v4356_v12 = vld [vmem:[%s5205_s18 + $0x12c] sm:$0xf0]  ;;  %v3171_v17 = vor.u32 %v4324_v9, %v3170_v8  ;;  %2045 = vmatpush.bf16.msra.mxu2 %v3443_v7  ;;  %v5317_v7 = vpack.c.b16 %v713_v1, %v713_v1 }
  0x7b   : > { %v3426_v13 = vld [vmem:[%s5205_s18 + $0x220] sm:$0xf]  ;;  %v4388_v14 = vld [vmem:[%s5205_s18 + $0x22c] sm:$0xf0]  ;;  %v3299_v20 = vor.u32 %v4356_v12, %v3298_v10  ;;  %2058 = vmatpush.bf16.msra.mxu3 %v3571_v11 }
  0x7c   : > { %v3554_v15 = vld [vmem:[%s5205_s18 + $0x320] sm:$0xf]  ;;  %v4420_v16 = vld [vmem:[%s5205_s18 + $0x32c] sm:$0xf0]  ;;  %v3427_v21 = vor.u32 %v4388_v14, %v3426_v13  ;;  %2020 = vmatpush.bf16.msra.mxu0 %v3171_v17 }
  0x7d   : > { %v3154_v18 = vld [vmem:[%s5205_s18] sm:$0xf]  ;;  %v4320_v19 = vld [vmem:[%s5205_s18 + $0xc] sm:$0xf0]  ;;  %v3555_v25 = vor.u32 %v4420_v16, %v3554_v15  ;;  %2033 = vmatpush.bf16.msra.mxu1 %v3299_v20 }
  0x7e   : > { %v3282_v22 = vld [vmem:[%s5205_s18 + $0x100] sm:$0xf]  ;;  %v4352_v23 = vld [vmem:[%s5205_s18 + $0x10c] sm:$0xf0]  ;;  %v3155_v32 = vor.u32 %v4320_v19, %v3154_v18  ;;  %2046 = vmatpush.bf16.msra.mxu2 %v3427_v21 }
  0x7f   : > { %v3410_v24 = vld [vmem:[%s5205_s18 + $0x200] sm:$0xf]  ;;  %v4384_v26 = vld [vmem:[%s5205_s18 + $0x20c] sm:$0xf0]  ;;  %v3283_v36 = vor.u32 %v4352_v23, %v3282_v22  ;;  %2059 = vmatpush.bf16.msra.mxu3 %v3555_v25 }
  0x80   : > { %v3538_v27 = vld [vmem:[%s5205_s18 + $0x300] sm:$0xf]  ;;  %v4416_v28 = vld [vmem:[%s5205_s18 + $0x30c] sm:$0xf0]  ;;  %v3411_v37 = vor.u32 %v4384_v26, %v3410_v24  ;;  %2021 = vmatpush.bf16.msra.mxu0 %v3155_v32 }
  0x81   : > { %v3778_v29 = vld [vmem:[%s5205_s18 + $0x4e0] sm:$0xf]  ;;  %v4476_v30 = vld [vmem:[%s5205_s18 + $0x4ec] sm:$0xf0]  ;;  %v3539_v40 = vor.u32 %v4416_v28, %v3538_v27  ;;  %2034 = vmatpush.bf16.msra.mxu1 %v3283_v36 }
  0x82   : > { %v3906_v31 = vld [vmem:[%s5205_s18 + $0x5e0] sm:$0xf]  ;;  %v4508_v33 = vld [vmem:[%s5205_s18 + $0x5ec] sm:$0xf0]  ;;  %v3779_v41 = vor.u32 %v4476_v30, %v3778_v29  ;;  %2047 = vmatpush.bf16.msra.mxu2 %v3411_v37 }
  0x83   : > { %v4034_v34 = vld [vmem:[%s5205_s18 + $0x6e0] sm:$0xf]  ;;  %v4540_v35 = vld [vmem:[%s5205_s18 + $0x6ec] sm:$0xf0]  ;;  %v3907_v42 = vor.u32 %v4508_v33, %v3906_v31  ;;  %2060 = vmatpush.bf16.msra.mxu3 %v3539_v40 }
  0x84   : > { %v4162_v38 = vld [vmem:[%s5205_s18 + $0x7e0] sm:$0xf]  ;;  %v4572_v39 = vld [vmem:[%s5205_s18 + $0x7ec] sm:$0xf0]  ;;  %v4035_v43 = vor.u32 %v4540_v35, %v4034_v34  ;;  %2066 = vmatpush.bf16.msrb.mxu0 %v3779_v41 }
  0x85   : > { %v3762_v44 = vld [vmem:[%s5205_s18 + $0x4c0] sm:$0xf]  ;;  %v4472_v45 = vld [vmem:[%s5205_s18 + $0x4cc] sm:$0xf0]  ;;  %v4163_v47 = vor.u32 %v4572_v39, %v4162_v38  ;;  %2079 = vmatpush.bf16.msrb.mxu1 %v3907_v42  ;;  %2048 = vmatmul.bf16.vlgmr.msra.gmra.mxu2 %v5314_v5 }
  0x86   : > { %v3890_v46 = vld [vmem:[%s5205_s18 + $0x5c0] sm:$0xf]  ;;  %v4504_v48 = vld [vmem:[%s5205_s18 + $0x5cc] sm:$0xf0]  ;;  %v3763_v53 = vor.u32 %v4472_v45, %v3762_v44  ;;  %2092 = vmatpush.bf16.msrb.mxu2 %v4035_v43  ;;  %2061 = vmatmul.bf16.vlgmr.msra.gmra.mxu3 %v5317_v7 }
  0x87   : > { %v4018_v49 = vld [vmem:[%s5205_s18 + $0x6c0] sm:$0xf]  ;;  %v4536_v50 = vld [vmem:[%s5205_s18 + $0x6cc] sm:$0xf0]  ;;  %v3891_v55 = vor.u32 %v4504_v48, %v3890_v46  ;;  %2105 = vmatpush.bf16.msrb.mxu3 %v4163_v47 }
  0x88   : > { %v4146_v51 = vld [vmem:[%s5205_s18 + $0x7c0] sm:$0xf]  ;;  %v4568_v52 = vld [vmem:[%s5205_s18 + $0x7cc] sm:$0xf0]  ;;  %v4019_v56 = vor.u32 %v4536_v50, %v4018_v49  ;;  %2067 = vmatpush.bf16.msrb.mxu0 %v3763_v53 }
  0x89   : > { %v3746_v54 = vld [vmem:[%s5205_s18 + $0x4a0] sm:$0xf]  ;;  %v4468_v57 = vld [vmem:[%s5205_s18 + $0x4ac] sm:$0xf0]  ;;  %v4147_v60 = vor.u32 %v4568_v52, %v4146_v51  ;;  %2080 = vmatpush.bf16.msrb.mxu1 %v3891_v55 }
  0x8a   : > { %v3874_v58 = vld [vmem:[%s5205_s18 + $0x5a0] sm:$0xf]  ;;  %v4500_v61 = vld [vmem:[%s5205_s18 + $0x5ac] sm:$0xf0]  ;;  %v3747_v4 = vor.u32 %v4468_v57, %v3746_v54  ;;  %2093 = vmatpush.bf16.msrb.mxu2 %v4019_v56 }
  0x8b   : > { %v4002_v62 = vld [vmem:[%s5205_s18 + $0x6a0] sm:$0xf]  ;;  %v4532_v63 = vld [vmem:[%s5205_s18 + $0x6ac] sm:$0xf0]  ;;  %v3875_v8 = vor.u32 %v4500_v61, %v3874_v58  ;;  %2106 = vmatpush.bf16.msrb.mxu3 %v4147_v60 }
  0x8c   : > { %v4130_v2 = vld [vmem:[%s5205_s18 + $0x7a0] sm:$0xf]  ;;  %v4564_v3 = vld [vmem:[%s5205_s18 + $0x7ac] sm:$0xf0]  ;;  %v4003_v9 = vor.u32 %v4532_v63, %v4002_v62  ;;  %2068 = vmatpush.bf16.msrb.mxu0 %v3747_v4  ;;  %v449_v4 = vld [vmem:[%s5198_s19 + $0x18] sm:$0xff] }
  0x8d   : > { %v446_v6 = vld [vmem:[%s5198_s19] sm:$0xff]  ;;  %v4464_v11 = vld [vmem:[%s5205_s18 + $0x48c] sm:$0xf0]  ;;  %v4131_v15 = vor.u32 %v4564_v3, %v4130_v2  ;;  %2081 = vmatpush.bf16.msrb.mxu1 %v3875_v8 }
  0x8e   : > { %v3730_v10 = vld [vmem:[%s5205_s18 + $0x480] sm:$0xf]  ;;  %v710_v13 = vunpack.c.l.b16 %v446_v6  ;;  %v711_v14 = vunpack.c.h.b16 %v446_v6  ;;  %v4496_v16 = vld [vmem:[%s5205_s18 + $0x58c] sm:$0xf0]  ;;  %2094 = vmatpush.bf16.msrb.mxu2 %v4003_v9 }
  0x8f   : > { %v3858_v12 = vld [vmem:[%s5205_s18 + $0x580] sm:$0xf]  ;;  %v4528_v18 = vld [vmem:[%s5205_s18 + $0x68c] sm:$0xf0]  ;;  %v3731_v23 = vor.u32 %v4464_v11, %v3730_v10  ;;  %2107 = vmatpush.bf16.msrb.mxu3 %v4131_v15  ;;  %v4346_v11 = vld [vmem:[%s5205_s18 + $0xe4] sm:$0xf] }
  0x90   : > { %v3986_v17 = vld [vmem:[%s5205_s18 + $0x680] sm:$0xf]  ;;  %v4560_v20 = vld [vmem:[%s5205_s18 + $0x78c] sm:$0xf0]  ;;  %v5328_v21 = vpack.c.b16 %v710_v13, %v710_v13  ;;  %v5331_v22 = vpack.c.b16 %v711_v14, %v711_v14  ;;  %v3859_v24 = vor.u32 %v4496_v16, %v3858_v12  ;;  %v3268_v12 = vld [vmem:[%s5205_s18 + $0xf0] sm:$0xf0] }
  0x91   : > { %v4114_v19 = vld [vmem:[%s5205_s18 + $0x780] sm:$0xf]  ;;  %v3987_v25 = vor.u32 %v4528_v18, %v3986_v17  ;;  %v4460_v27 = vld [vmem:[%s5205_s18 + $0x46c] sm:$0xf0]  ;;  %2069 = vmatpush.bf16.msrb.mxu0 %v3731_v23  ;;  %v4378_v13 = vld [vmem:[%s5205_s18 + $0x1e4] sm:$0xf]  ;;  %v716_v18 = vunpack.c.l.b16 %v449_v4 }
  0x92   : > { %v3714_v26 = vld [vmem:[%s5205_s18 + $0x460] sm:$0xf]  ;;  %v4115_v29 = vor.u32 %v4560_v20, %v4114_v19  ;;  %v4492_v30 = vld [vmem:[%s5205_s18 + $0x56c] sm:$0xf0]  ;;  %2022 = vmatmul.bf16.vlgmr.msra.gmra.mxu0 %v5328_v21  ;;  %2035 = vmatmul.bf16.vlgmr.msra.gmra.mxu1 %v5331_v22  ;;  %v3396_v15 = vld [vmem:[%s5205_s18 + $0x1f0] sm:$0xf0] }
  0x93   : > { %v3842_v28 = vld [vmem:[%s5205_s18 + $0x560] sm:$0xf]  ;;  %v4524_v32 = vld [vmem:[%s5205_s18 + $0x66c] sm:$0xf0]  ;;  %v3715_v35 = vor.u32 %v4460_v27, %v3714_v26  ;;  %2082 = vmatpush.bf16.msrb.mxu1 %v3859_v24  ;;  %2095 = vmatpush.bf16.msrb.mxu2 %v3987_v25  ;;  %v4410_v16 = vld [vmem:[%s5205_s18 + $0x2e4] sm:$0xf]  ;;  %v717_v26 = vunpack.c.h.b16 %v449_v4 }
  0x94   : > { %v3970_v31 = vld [vmem:[%s5205_s18 + $0x660] sm:$0xf]  ;;  %v4556_v34 = vld [vmem:[%s5205_s18 + $0x76c] sm:$0xf0]  ;;  %v3843_v36 = vor.u32 %v4492_v30, %v3842_v28  ;;  %2108 = vmatpush.bf16.msrb.mxu3 %v4115_v29  ;;  %v3524_v17 = vld [vmem:[%s5205_s18 + $0x2f0] sm:$0xf0]  ;;  %v3271_v28 = vor.u32 %v4346_v11, %v3268_v12  ;;  %v3399_v30 = vor.u32 %v4378_v13, %v3396_v15 }
  0x95   : > { %v4098_v33 = vld [vmem:[%s5205_s18 + $0x760] sm:$0xf]  ;;  %v3971_v37 = vor.u32 %v4524_v32, %v3970_v31  ;;  %v4456_v39 = vld [vmem:[%s5205_s18 + $0x44c] sm:$0xf0]  ;;  %2070 = vmatpush.bf16.msrb.mxu0 %v3715_v35  ;;  %v4442_v23 = vld [vmem:[%s5205_s18 + $0x3e4] sm:$0xf]  ;;  %v3527_v31 = vor.u32 %v4410_v16, %v3524_v17 }
  0x96   : > { %v3698_v38 = vld [vmem:[%s5205_s18 + $0x440] sm:$0xf]  ;;  %v4099_v41 = vor.u32 %v4556_v34, %v4098_v33  ;;  %v4488_v42 = vld [vmem:[%s5205_s18 + $0x54c] sm:$0xf0]  ;;  %v3652_v24 = vld [vmem:[%s5205_s18 + $0x3f0] sm:$0xf0] }
  0x97   : > { %v3826_v40 = vld [vmem:[%s5205_s18 + $0x540] sm:$0xf]  ;;  %v4520_v44 = vld [vmem:[%s5205_s18 + $0x64c] sm:$0xf0]  ;;  %v3699_v47 = vor.u32 %v4456_v39, %v3698_v38  ;;  %2083 = vmatpush.bf16.msrb.mxu1 %v3843_v36  ;;  %2096 = vmatpush.bf16.msrb.mxu2 %v3971_v37  ;;  %v4342_v32 = vld [vmem:[%s5205_s18 + $0xc4] sm:$0xf]  ;;  %v3655_v35 = vor.u32 %v4442_v23, %v3652_v24  ;;  %v5383_v39 = vpack.c.b16 %v716_v18, %v716_v18 }
  0x98   : > { %v3954_v43 = vld [vmem:[%s5205_s18 + $0x640] sm:$0xf]  ;;  %v4552_v46 = vld [vmem:[%s5205_s18 + $0x74c] sm:$0xf0]  ;;  %v3827_v48 = vor.u32 %v4488_v42, %v3826_v40  ;;  %2109 = vmatpush.bf16.msrb.mxu3 %v4099_v41  ;;  %v3252_v33 = vld [vmem:[%s5205_s18 + $0xd0] sm:$0xf0] }
  0x99   : > { %v4082_v45 = vld [vmem:[%s5205_s18 + $0x740] sm:$0xf]  ;;  %v3955_v49 = vor.u32 %v4520_v44, %v3954_v43  ;;  %v4452_v51 = vld [vmem:[%s5205_s18 + $0x42c] sm:$0xf0]  ;;  %2071 = vmatpush.bf16.msrb.mxu0 %v3699_v47  ;;  %v4374_v34 = vld [vmem:[%s5205_s18 + $0x1c4] sm:$0xf]  ;;  %v5389_v43 = vpack.c.b16 %v717_v26, %v717_v26  ;;  %v3255_v44 = vor.u32 %v4342_v32, %v3252_v33 }
  0x9a   : > { %v3682_v50 = vld [vmem:[%s5205_s18 + $0x420] sm:$0xf]  ;;  %v4083_v53 = vor.u32 %v4552_v46, %v4082_v45  ;;  %v4484_v54 = vld [vmem:[%s5205_s18 + $0x52c] sm:$0xf0]  ;;  %v3380_v36 = vld [vmem:[%s5205_s18 + $0x1d0] sm:$0xf0] }
  0x9b   : > { %v3810_v52 = vld [vmem:[%s5205_s18 + $0x520] sm:$0xf]  ;;  %v4516_v56 = vld [vmem:[%s5205_s18 + $0x62c] sm:$0xf0]  ;;  %v3683_v60 = vor.u32 %v4452_v51, %v3682_v50  ;;  %2084 = vmatpush.bf16.msrb.mxu1 %v3827_v48  ;;  %2097 = vmatpush.bf16.msrb.mxu2 %v3955_v49  ;;  %v4406_v37 = vld [vmem:[%s5205_s18 + $0x2c4] sm:$0xf]  ;;  %v3383_v46 = vor.u32 %v4374_v34, %v3380_v36 }
  0x9c   : > { %v3938_v55 = vld [vmem:[%s5205_s18 + $0x620] sm:$0xf]  ;;  %v4548_v58 = vld [vmem:[%s5205_s18 + $0x72c] sm:$0xf0]  ;;  %v3811_v0 = vor.u32 %v4484_v54, %v3810_v52  ;;  %2110 = vmatpush.bf16.msrb.mxu3 %v4083_v53  ;;  %v3508_v38 = vld [vmem:[%s5205_s18 + $0x2d0] sm:$0xf0] }
  0x9d   : > { %v4066_v57 = vld [vmem:[%s5205_s18 + $0x720] sm:$0xf]  ;;  %v4448_v61 = vld [vmem:[%s5205_s18 + $0x40c] sm:$0xf0]  ;;  %v3939_v1 = vor.u32 %v4516_v56, %v3938_v55  ;;  %2072 = vmatpush.bf16.msrb.mxu0 %v3683_v60  ;;  %v4438_v40 = vld [vmem:[%s5205_s18 + $0x3c4] sm:$0xf]  ;;  %v3511_v47 = vor.u32 %v4406_v37, %v3508_v38 }
  0x9e   : > { %v3666_v59 = vld [vmem:[%s5205_s18 + $0x400] sm:$0xf]  ;;  %v4480_v63 = vld [vmem:[%s5205_s18 + $0x50c] sm:$0xf0]  ;;  %v4067_v6 = vor.u32 %v4548_v58, %v4066_v57  ;;  %v3636_v41 = vld [vmem:[%s5205_s18 + $0x3d0] sm:$0xf0] }
  0x9f   : > { %v3794_v62 = vld [vmem:[%s5205_s18 + $0x500] sm:$0xf]  ;;  %v4512_v3 = vld [vmem:[%s5205_s18 + $0x60c] sm:$0xf0]  ;;  %v3667_v14 = vor.u32 %v4448_v61, %v3666_v59  ;;  %2085 = vmatpush.bf16.msrb.mxu1 %v3811_v0  ;;  %2098 = vmatpush.bf16.msrb.mxu2 %v3939_v1  ;;  %v4338_v48 = vld [vmem:[%s5205_s18 + $0xa4] sm:$0xf]  ;;  %v3639_v51 = vor.u32 %v4438_v40, %v3636_v41 }
  0xa0   : > { %v3922_v2 = vld [vmem:[%s5205_s18 + $0x600] sm:$0xf]  ;;  %v4544_v9 = vld [vmem:[%s5205_s18 + $0x70c] sm:$0xf0]  ;;  %v3795_v19 = vor.u32 %v4480_v63, %v3794_v62  ;;  %2111 = vmatpush.bf16.msrb.mxu3 %v4067_v6  ;;  %v3236_v49 = vld [vmem:[%s5205_s18 + $0xb0] sm:$0xf0] }
  0xa1   : > { %v4050_v8 = vld [vmem:[%s5205_s18 + $0x700] sm:$0xf]  ;;  %v448_v10 = vld [vmem:[%s5198_s19 + $0x10] sm:$0xff]  ;;  %v3923_v20 = vor.u32 %v4512_v3, %v3922_v2  ;;  %2073 = vmatpush.bf16.msrb.mxu0 %v3667_v14  ;;  %v4370_v50 = vld [vmem:[%s5205_s18 + $0x1a4] sm:$0xf]  ;;  %v3239_v57 = vor.u32 %v4338_v48, %v3236_v49 }
  0xa2   : > { %v714_v25 = vunpack.c.l.b16 %v448_v10  ;;  %v4051_v27 = vor.u32 %v4544_v9, %v4050_v8  ;;  %v715_v29 = vunpack.c.h.b16 %v448_v10  ;;  %v3364_v52 = vld [vmem:[%s5205_s18 + $0x1b0] sm:$0xf0]  ;;  %v4402_v53 = vld [vmem:[%s5205_s18 + $0x2a4] sm:$0xf] }
  0xa3   : > { %2086 = vmatpush.bf16.msrb.mxu1 %v3795_v19  ;;  %2099 = vmatpush.bf16.msrb.mxu2 %v3923_v20  ;;  %v3492_v54 = vld [vmem:[%s5205_s18 + $0x2b0] sm:$0xf0]  ;;  %v4434_v55 = vld [vmem:[%s5205_s18 + $0x3a4] sm:$0xf]  ;;  %v3367_v58 = vor.u32 %v4370_v50, %v3364_v52 }
  0xa4   : > { %v5387_v42 = vpack.c.b16 %v714_v25, %v714_v25  ;;  %2112 = vmatpush.bf16.msrb.mxu3 %v4051_v27  ;;  %v5391_v45 = vpack.c.b16 %v715_v29, %v715_v29  ;;  %v3620_v56 = vld [vmem:[%s5205_s18 + $0x3b0] sm:$0xf0]  ;;  %v3495_v59 = vor.u32 %v4402_v53, %v3492_v54  ;;  %v4334_v60 = vld [vmem:[%s5205_s18 + $0x84] sm:$0xf] }
  0xa5   : > { %2118 = vmatpush.bf16.msra.mxu0 %v3271_v28  ;;  %v3220_v61 = vld [vmem:[%s5205_s18 + $0x90] sm:$0xf0]  ;;  %v4366_v62 = vld [vmem:[%s5205_s18 + $0x184] sm:$0xf]  ;;  %v3623_v63 = vor.u32 %v4434_v55, %v3620_v56 }
  0xa6   : > { %2100 = vmatmul.bf16.vlgmr.msrb.gmra.mxu2 %v5383_v39  ;;  %2074 = vmatmul.bf16.vlgmr.msrb.gmra.mxu0 %v5387_v42  ;;  %v3348_v0 = vld [vmem:[%s5205_s18 + $0x190] sm:$0xf0]  ;;  %v4398_v1 = vld [vmem:[%s5205_s18 + $0x284] sm:$0xf]  ;;  %v3223_v6 = vor.u32 %v4334_v60, %v3220_v61 }
  0xa7   : > { %2131 = vmatpush.bf16.msra.mxu1 %v3399_v30  ;;  %2144 = vmatpush.bf16.msra.mxu2 %v3527_v31  ;;  %v3476_v2 = vld [vmem:[%s5205_s18 + $0x290] sm:$0xf0]  ;;  %v4430_v3 = vld [vmem:[%s5205_s18 + $0x384] sm:$0xf]  ;;  %v3351_v8 = vor.u32 %v4366_v62, %v3348_v0 }
  0xa8   : > { %2157 = vmatpush.bf16.msra.mxu3 %v3655_v35  ;;  %2087 = vmatmul.bf16.vlgmr.msrb.gmra.mxu1 %v5391_v45  ;;  %v3604_v4 = vld [vmem:[%s5205_s18 + $0x390] sm:$0xf0]  ;;  %v3479_v9 = vor.u32 %v4398_v1, %v3476_v2  ;;  %v4330_v10 = vld [vmem:[%s5205_s18 + $0x64] sm:$0xf] }
  0xa9   : > { %2113 = vmatmul.bf16.vlgmr.msrb.gmra.mxu3 %v5389_v43  ;;  %2119 = vmatpush.bf16.msra.mxu0 %v3255_v44  ;;  %v3204_v11 = vld [vmem:[%s5205_s18 + $0x70] sm:$0xf0]  ;;  %v4362_v12 = vld [vmem:[%s5205_s18 + $0x164] sm:$0xf]  ;;  %v3607_v13 = vor.u32 %v4430_v3, %v3604_v4 }
  0xaa   : > { %v3332_v14 = vld [vmem:[%s5205_s18 + $0x170] sm:$0xf0]  ;;  %v4394_v15 = vld [vmem:[%s5205_s18 + $0x264] sm:$0xf]  ;;  %v3207_v19 = vor.u32 %v4330_v10, %v3204_v11 }
  0xab   : > { %2132 = vmatpush.bf16.msra.mxu1 %v3383_v46  ;;  %2145 = vmatpush.bf16.msra.mxu2 %v3511_v47  ;;  %v3460_v16 = vld [vmem:[%s5205_s18 + $0x270] sm:$0xf0]  ;;  %v4426_v17 = vld [vmem:[%s5205_s18 + $0x364] sm:$0xf]  ;;  %v3335_v20 = vor.u32 %v4362_v12, %v3332_v14 }
  0xac   : > { %2158 = vmatpush.bf16.msra.mxu3 %v3639_v51  ;;  %v3588_v18 = vld [vmem:[%s5205_s18 + $0x370] sm:$0xf0]  ;;  %v3463_v23 = vor.u32 %v4394_v15, %v3460_v16  ;;  %v4326_v24 = vld [vmem:[%s5205_s18 + $0x44] sm:$0xf] }
  0xad   : > { %2120 = vmatpush.bf16.msra.mxu0 %v3239_v57  ;;  %v3188_v25 = vld [vmem:[%s5205_s18 + $0x50] sm:$0xf0]  ;;  %v4358_v26 = vld [vmem:[%s5205_s18 + $0x144] sm:$0xf]  ;;  %v3591_v27 = vor.u32 %v4426_v17, %v3588_v18 }
  0xae   : > { %v3316_v28 = vld [vmem:[%s5205_s18 + $0x150] sm:$0xf0]  ;;  %v4390_v29 = vld [vmem:[%s5205_s18 + $0x244] sm:$0xf]  ;;  %v3191_v33 = vor.u32 %v4326_v24, %v3188_v25 }
  0xaf   : > { %2133 = vmatpush.bf16.msra.mxu1 %v3367_v58  ;;  %2146 = vmatpush.bf16.msra.mxu2 %v3495_v59  ;;  %v3444_v30 = vld [vmem:[%s5205_s18 + $0x250] sm:$0xf0]  ;;  %v4422_v31 = vld [vmem:[%s5205_s18 + $0x344] sm:$0xf]  ;;  %v3319_v34 = vor.u32 %v4358_v26, %v3316_v28 }
  0xb0   : > { %2159 = vmatpush.bf16.msra.mxu3 %v3623_v63  ;;  %v3572_v32 = vld [vmem:[%s5205_s18 + $0x350] sm:$0xf0]  ;;  %v3447_v35 = vor.u32 %v4390_v29, %v3444_v30  ;;  %v4322_v36 = vld [vmem:[%s5205_s18 + $0x24] sm:$0xf] }
  0xb1   : > { %2121 = vmatpush.bf16.msra.mxu0 %v3223_v6  ;;  %v3172_v37 = vld [vmem:[%s5205_s18 + $0x30] sm:$0xf0]  ;;  %v4354_v38 = vld [vmem:[%s5205_s18 + $0x124] sm:$0xf]  ;;  %v3575_v40 = vor.u32 %v4422_v31, %v3572_v32 }
  0xb2   : > { %v3300_v41 = vld [vmem:[%s5205_s18 + $0x130] sm:$0xf0]  ;;  %v4386_v44 = vld [vmem:[%s5205_s18 + $0x224] sm:$0xf]  ;;  %v3175_v49 = vor.u32 %v4322_v36, %v3172_v37 }
  0xb3   : > { %2134 = vmatpush.bf16.msra.mxu1 %v3351_v8  ;;  %2147 = vmatpush.bf16.msra.mxu2 %v3479_v9  ;;  %v3428_v46 = vld [vmem:[%s5205_s18 + $0x230] sm:$0xf0]  ;;  %v4418_v47 = vld [vmem:[%s5205_s18 + $0x324] sm:$0xf]  ;;  %v3303_v52 = vor.u32 %v4354_v38, %v3300_v41 }
  0xb4   : > { %2160 = vmatpush.bf16.msra.mxu3 %v3607_v13  ;;  %v3556_v48 = vld [vmem:[%s5205_s18 + $0x330] sm:$0xf0]  ;;  %v4318_v50 = vld [vmem:[%s5205_s18 + $0x4] sm:$0xf]  ;;  %v3431_v53 = vor.u32 %v4386_v44, %v3428_v46 }
  0xb5   : > { %2122 = vmatpush.bf16.msra.mxu0 %v3207_v19  ;;  %v3156_v51 = vld [vmem:[%s5205_s18 + $0x10] sm:$0xf0]  ;;  %v4350_v54 = vld [vmem:[%s5205_s18 + $0x104] sm:$0xf]  ;;  %v3559_v57 = vor.u32 %v4418_v47, %v3556_v48 }
  0xb6   : > { %v3284_v55 = vld [vmem:[%s5205_s18 + $0x110] sm:$0xf0]  ;;  %v4382_v56 = vld [vmem:[%s5205_s18 + $0x204] sm:$0xf]  ;;  %v3159_v0 = vor.u32 %v4318_v50, %v3156_v51 }
  0xb7   : > { %2135 = vmatpush.bf16.msra.mxu1 %v3335_v20  ;;  %2148 = vmatpush.bf16.msra.mxu2 %v3463_v23  ;;  %v3412_v58 = vld [vmem:[%s5205_s18 + $0x210] sm:$0xf0]  ;;  %v4414_v59 = vld [vmem:[%s5205_s18 + $0x304] sm:$0xf]  ;;  %v3287_v4 = vor.u32 %v4350_v54, %v3284_v55 }
  0xb8   : > { %2161 = vmatpush.bf16.msra.mxu3 %v3591_v27  ;;  %v3540_v60 = vld [vmem:[%s5205_s18 + $0x310] sm:$0xf0]  ;;  %v4474_v61 = vld [vmem:[%s5205_s18 + $0x4e4] sm:$0xf]  ;;  %v3415_v6 = vor.u32 %v4382_v56, %v3412_v58 }
  0xb9   : > { %2123 = vmatpush.bf16.msra.mxu0 %v3191_v33  ;;  %v3780_v62 = vld [vmem:[%s5205_s18 + $0x4f0] sm:$0xf0]  ;;  %v4506_v63 = vld [vmem:[%s5205_s18 + $0x5e4] sm:$0xf]  ;;  %v3543_v10 = vor.u32 %v4414_v59, %v3540_v60 }
  0xba   : > { %v3908_v1 = vld [vmem:[%s5205_s18 + $0x5f0] sm:$0xf0]  ;;  %v4538_v2 = vld [vmem:[%s5205_s18 + $0x6e4] sm:$0xf]  ;;  %v3783_v11 = vor.u32 %v4474_v61, %v3780_v62 }
  0xbb   : > { %2136 = vmatpush.bf16.msra.mxu1 %v3319_v34  ;;  %2149 = vmatpush.bf16.msra.mxu2 %v3447_v35  ;;  %v4036_v3 = vld [vmem:[%s5205_s18 + $0x6f0] sm:$0xf0]  ;;  %v4570_v8 = vld [vmem:[%s5205_s18 + $0x7e4] sm:$0xf]  ;;  %v3911_v12 = vor.u32 %v4506_v63, %v3908_v1 }
  0xbc   : > { %2162 = vmatpush.bf16.msra.mxu3 %v3575_v40  ;;  %v4164_v9 = vld [vmem:[%s5205_s18 + $0x7f0] sm:$0xf0]  ;;  %v4039_v13 = vor.u32 %v4538_v2, %v4036_v3  ;;  %v4470_v14 = vld [vmem:[%s5205_s18 + $0x4c4] sm:$0xf] }
  0xbd   : > { %2124 = vmatpush.bf16.msra.mxu0 %v3175_v49  ;;  %v3764_v15 = vld [vmem:[%s5205_s18 + $0x4d0] sm:$0xf0]  ;;  %v4502_v16 = vld [vmem:[%s5205_s18 + $0x5c4] sm:$0xf]  ;;  %v4167_v17 = vor.u32 %v4570_v8, %v4164_v9 }
  0xbe   : > { %v3892_v18 = vld [vmem:[%s5205_s18 + $0x5d0] sm:$0xf0]  ;;  %v4534_v19 = vld [vmem:[%s5205_s18 + $0x6c4] sm:$0xf]  ;;  %v3767_v25 = vor.u32 %v4470_v14, %v3764_v15 }
  0xbf   : > { %2137 = vmatpush.bf16.msra.mxu1 %v3303_v52  ;;  %2150 = vmatpush.bf16.msra.mxu2 %v3431_v53  ;;  %v4020_v20 = vld [vmem:[%s5205_s18 + $0x6d0] sm:$0xf0]  ;;  %v4566_v23 = vld [vmem:[%s5205_s18 + $0x7c4] sm:$0xf]  ;;  %v3895_v26 = vor.u32 %v4502_v16, %v3892_v18 }
  0xc0   : > { %2163 = vmatpush.bf16.msra.mxu3 %v3559_v57  ;;  %v4148_v24 = vld [vmem:[%s5205_s18 + $0x7d0] sm:$0xf0]  ;;  %v4023_v27 = vor.u32 %v4534_v19, %v4020_v20  ;;  %v4466_v28 = vld [vmem:[%s5205_s18 + $0x4a4] sm:$0xf] }
  0xc1   : > { %2125 = vmatpush.bf16.msra.mxu0 %v3159_v0  ;;  %v3748_v29 = vld [vmem:[%s5205_s18 + $0x4b0] sm:$0xf0]  ;;  %v4498_v30 = vld [vmem:[%s5205_s18 + $0x5a4] sm:$0xf]  ;;  %v4151_v31 = vor.u32 %v4566_v23, %v4148_v24 }
  0xc2   : > { %v3876_v32 = vld [vmem:[%s5205_s18 + $0x5b0] sm:$0xf0]  ;;  %v4530_v33 = vld [vmem:[%s5205_s18 + $0x6a4] sm:$0xf]  ;;  %v3751_v37 = vor.u32 %v4466_v28, %v3748_v29 }
  0xc3   : > { %2138 = vmatpush.bf16.msra.mxu1 %v3287_v4  ;;  %2151 = vmatpush.bf16.msra.mxu2 %v3415_v6  ;;  %v4004_v34 = vld [vmem:[%s5205_s18 + $0x6b0] sm:$0xf0]  ;;  %v4562_v35 = vld [vmem:[%s5205_s18 + $0x7a4] sm:$0xf]  ;;  %v3879_v38 = vor.u32 %v4498_v30, %v3876_v32 }
  0xc4   : > { %2164 = vmatpush.bf16.msra.mxu3 %v3543_v10  ;;  %v4132_v36 = vld [vmem:[%s5205_s18 + $0x7b0] sm:$0xf0]  ;;  %2126 = vmatmul.bf16.vlgmr.msra.gmra.mxu0 %v5328_v21  ;;  %v4007_v40 = vor.u32 %v4530_v33, %v4004_v34  ;;  %v4462_v41 = vld [vmem:[%s5205_s18 + $0x484] sm:$0xf] }
  0xc5   : > { %2170 = vmatpush.bf16.msrb.mxu0 %v3783_v11  ;;  %v3732_v44 = vld [vmem:[%s5205_s18 + $0x490] sm:$0xf0]  ;;  %v4494_v46 = vld [vmem:[%s5205_s18 + $0x584] sm:$0xf]  ;;  %v4135_v47 = vor.u32 %v4562_v35, %v4132_v36 }
  0xc6   : > { %2152 = vmatmul.bf16.vlgmr.msra.gmra.mxu2 %v5314_v5  ;;  %2139 = vmatmul.bf16.vlgmr.msra.gmra.mxu1 %v5331_v22  ;;  %v3860_v48 = vld [vmem:[%s5205_s18 + $0x590] sm:$0xf0]  ;;  %v4526_v49 = vld [vmem:[%s5205_s18 + $0x684] sm:$0xf]  ;;  %v3735_v53 = vor.u32 %v4462_v41, %v3732_v44  ;;  %v3274_v44 = vld [vmem:[%s5205_s18 + $0xe8] sm:$0xf] }
  0xc7   : > { %2183 = vmatpush.bf16.msrb.mxu1 %v3911_v12  ;;  %2196 = vmatpush.bf16.msrb.mxu2 %v4039_v13  ;;  %v3988_v50 = vld [vmem:[%s5205_s18 + $0x690] sm:$0xf0]  ;;  %v4558_v51 = vld [vmem:[%s5205_s18 + $0x784] sm:$0xf]  ;;  %v3863_v54 = vor.u32 %v4494_v46, %v3860_v48  ;;  %v4349_v46 = vld [vmem:[%s5205_s18 + $0xf4] sm:$0xf0] }
  0xc8   : > { %2209 = vmatpush.bf16.msrb.mxu3 %v4167_v17  ;;  %v4116_v52 = vld [vmem:[%s5205_s18 + $0x790] sm:$0xf0]  ;;  %v3991_v55 = vor.u32 %v4526_v49, %v3988_v50  ;;  %v4458_v56 = vld [vmem:[%s5205_s18 + $0x464] sm:$0xf]  ;;  %v4381_v49 = vld [vmem:[%s5205_s18 + $0x1f4] sm:$0xf0] }
  0xc9   : > { %2165 = vmatmul.bf16.vlgmr.msra.gmra.mxu3 %v5317_v7  ;;  %2171 = vmatpush.bf16.msrb.mxu0 %v3767_v25  ;;  %v3716_v57 = vld [vmem:[%s5205_s18 + $0x470] sm:$0xf0]  ;;  %v4490_v58 = vld [vmem:[%s5205_s18 + $0x564] sm:$0xf]  ;;  %v4119_v59 = vor.u32 %v4558_v51, %v4116_v52  ;;  %v3530_v50 = vld [vmem:[%s5205_s18 + $0x2e8] sm:$0xf] }
  0xca   : > { %v3844_v60 = vld [vmem:[%s5205_s18 + $0x570] sm:$0xf0]  ;;  %v4522_v61 = vld [vmem:[%s5205_s18 + $0x664] sm:$0xf]  ;;  %v3719_v1 = vor.u32 %v4458_v56, %v3716_v57  ;;  %v4413_v51 = vld [vmem:[%s5205_s18 + $0x2f4] sm:$0xf0]  ;;  %v3275_v57 = vor.u32 %v4349_v46, %v3274_v44 }
  0xcb   : > { %2184 = vmatpush.bf16.msrb.mxu1 %v3895_v26  ;;  %2197 = vmatpush.bf16.msrb.mxu2 %v4023_v27  ;;  %v3972_v62 = vld [vmem:[%s5205_s18 + $0x670] sm:$0xf0]  ;;  %v4554_v63 = vld [vmem:[%s5205_s18 + $0x764] sm:$0xf]  ;;  %v3847_v2 = vor.u32 %v4490_v58, %v3844_v60  ;;  %v3258_v60 = vld [vmem:[%s5205_s18 + $0xc8] sm:$0xf] }
  0xcc   : > { %2210 = vmatpush.bf16.msrb.mxu3 %v4151_v31  ;;  %v4100_v0 = vld [vmem:[%s5205_s18 + $0x770] sm:$0xf0]  ;;  %v3975_v3 = vor.u32 %v4522_v61, %v3972_v62  ;;  %v4454_v4 = vld [vmem:[%s5205_s18 + $0x444] sm:$0xf]  ;;  %v4345_v61 = vld [vmem:[%s5205_s18 + $0xd4] sm:$0xf0] }
  0xcd   : > { %2172 = vmatpush.bf16.msrb.mxu0 %v3751_v37  ;;  %v3700_v6 = vld [vmem:[%s5205_s18 + $0x450] sm:$0xf0]  ;;  %v4486_v8 = vld [vmem:[%s5205_s18 + $0x544] sm:$0xf]  ;;  %v4103_v9 = vor.u32 %v4554_v63, %v4100_v0  ;;  %v3386_v62 = vld [vmem:[%s5205_s18 + $0x1c8] sm:$0xf] }
  0xce   : > { %v3828_v10 = vld [vmem:[%s5205_s18 + $0x550] sm:$0xf0]  ;;  %v4518_v11 = vld [vmem:[%s5205_s18 + $0x644] sm:$0xf]  ;;  %v3703_v15 = vor.u32 %v4454_v4, %v3700_v6  ;;  %v4377_v0 = vld [vmem:[%s5205_s18 + $0x1d4] sm:$0xf0]  ;;  %v3259_v6 = vor.u32 %v4345_v61, %v3258_v60 }
  0xcf   : > { %2185 = vmatpush.bf16.msrb.mxu1 %v3879_v38  ;;  %2198 = vmatpush.bf16.msrb.mxu2 %v4007_v40  ;;  %v3956_v12 = vld [vmem:[%s5205_s18 + $0x650] sm:$0xf0]  ;;  %v4550_v13 = vld [vmem:[%s5205_s18 + $0x744] sm:$0xf]  ;;  %v3831_v16 = vor.u32 %v4486_v8, %v3828_v10  ;;  %v4441_v4 = vld [vmem:[%s5205_s18 + $0x3d4] sm:$0xf0]  ;;  %v3387_v8 = vor.u32 %v4377_v0, %v3386_v62 }
  0xd0   : > { %2211 = vmatpush.bf16.msrb.mxu3 %v4135_v47  ;;  %v4084_v14 = vld [vmem:[%s5205_s18 + $0x750] sm:$0xf0]  ;;  %v3959_v17 = vor.u32 %v4518_v11, %v3956_v12  ;;  %v4450_v18 = vld [vmem:[%s5205_s18 + $0x424] sm:$0xf]  ;;  %v3402_v47 = vld [vmem:[%s5205_s18 + $0x1e8] sm:$0xf] }
  0xd1   : > { %2173 = vmatpush.bf16.msrb.mxu0 %v3735_v53  ;;  %v3684_v19 = vld [vmem:[%s5205_s18 + $0x430] sm:$0xf0]  ;;  %v4482_v20 = vld [vmem:[%s5205_s18 + $0x524] sm:$0xf]  ;;  %v4087_v23 = vor.u32 %v4550_v13, %v4084_v14  ;;  %v3403_v58 = vor.u32 %v4381_v49, %v3402_v47  ;;  %v3242_v10 = vld [vmem:[%s5205_s18 + $0xa8] sm:$0xf] }
  0xd2   : > { %v3812_v24 = vld [vmem:[%s5205_s18 + $0x530] sm:$0xf0]  ;;  %v4514_v25 = vld [vmem:[%s5205_s18 + $0x624] sm:$0xf]  ;;  %v3687_v29 = vor.u32 %v4450_v18, %v3684_v19  ;;  %v4341_v11 = vld [vmem:[%s5205_s18 + $0xb4] sm:$0xf0] }
  0xd3   : > { %2186 = vmatpush.bf16.msrb.mxu1 %v3863_v54  ;;  %2199 = vmatpush.bf16.msrb.mxu2 %v3991_v55  ;;  %v3940_v26 = vld [vmem:[%s5205_s18 + $0x630] sm:$0xf0]  ;;  %v4546_v27 = vld [vmem:[%s5205_s18 + $0x724] sm:$0xf]  ;;  %v3815_v32 = vor.u32 %v4482_v20, %v3812_v24  ;;  %v3658_v54 = vld [vmem:[%s5205_s18 + $0x3e8] sm:$0xf]  ;;  %v3243_v19 = vor.u32 %v4341_v11, %v3242_v10 }
  0xd4   : > { %2212 = vmatpush.bf16.msrb.mxu3 %v4119_v59  ;;  %v4068_v28 = vld [vmem:[%s5205_s18 + $0x730] sm:$0xf0]  ;;  %v4446_v30 = vld [vmem:[%s5205_s18 + $0x404] sm:$0xf]  ;;  %v3943_v33 = vor.u32 %v4514_v25, %v3940_v26  ;;  %v4445_v55 = vld [vmem:[%s5205_s18 + $0x3f4] sm:$0xf0]  ;;  %v3531_v59 = vor.u32 %v4413_v51, %v3530_v50 }
  0xd5   : > { %2174 = vmatpush.bf16.msrb.mxu0 %v3719_v1  ;;  %v3668_v31 = vld [vmem:[%s5205_s18 + $0x410] sm:$0xf0]  ;;  %v4478_v34 = vld [vmem:[%s5205_s18 + $0x504] sm:$0xf]  ;;  %v4071_v37 = vor.u32 %v4546_v27, %v4068_v28  ;;  %v3659_v63 = vor.u32 %v4445_v55, %v3658_v54  ;;  %v3514_v1 = vld [vmem:[%s5205_s18 + $0x2c8] sm:$0xf] }
  0xd6   : > { %v3796_v35 = vld [vmem:[%s5205_s18 + $0x510] sm:$0xf0]  ;;  %v4510_v36 = vld [vmem:[%s5205_s18 + $0x604] sm:$0xf]  ;;  %v3671_v48 = vor.u32 %v4446_v30, %v3668_v31  ;;  %v3370_v12 = vld [vmem:[%s5205_s18 + $0x1a8] sm:$0xf] }
  0xd7   : > { %2187 = vmatpush.bf16.msrb.mxu1 %v3847_v2  ;;  %2200 = vmatpush.bf16.msrb.mxu2 %v3975_v3  ;;  %v3924_v38 = vld [vmem:[%s5205_s18 + $0x610] sm:$0xf0]  ;;  %v4542_v40 = vld [vmem:[%s5205_s18 + $0x704] sm:$0xf]  ;;  %v3799_v52 = vor.u32 %v4478_v34, %v3796_v35  ;;  %v4409_v2 = vld [vmem:[%s5205_s18 + $0x2d4] sm:$0xf0] }
  0xd8   : > { %2213 = vmatpush.bf16.msrb.mxu3 %v4103_v9  ;;  %v4052_v41 = vld [vmem:[%s5205_s18 + $0x710] sm:$0xf0]  ;;  %v3927_v53 = vor.u32 %v4510_v36, %v3924_v38  ;;  %v3642_v3 = vld [vmem:[%s5205_s18 + $0x3c8] sm:$0xf]  ;;  %v3515_v9 = vor.u32 %v4409_v2, %v3514_v1  ;;  %v4373_v14 = vld [vmem:[%s5205_s18 + $0x1b4] sm:$0xf0] }
  0xd9   : > { %2175 = vmatpush.bf16.msrb.mxu0 %v3703_v15  ;;  %v4055_v56 = vor.u32 %v4542_v40, %v4052_v41  ;;  %v3643_v13 = vor.u32 %v4441_v4, %v3642_v3  ;;  %v3498_v15 = vld [vmem:[%s5205_s18 + $0x2a8] sm:$0xf]  ;;  %v4437_v18 = vld [vmem:[%s5205_s18 + $0x3b4] sm:$0xf0]  ;;  %v3371_v20 = vor.u32 %v4373_v14, %v3370_v12 }
  0xda   : > { %v3226_v24 = vld [vmem:[%s5205_s18 + $0x88] sm:$0xf]  ;;  %v4337_v25 = vld [vmem:[%s5205_s18 + $0x94] sm:$0xf0] }
  0xdb   : > { %2188 = vmatpush.bf16.msrb.mxu1 %v3831_v16  ;;  %2201 = vmatpush.bf16.msrb.mxu2 %v3959_v17  ;;  %v4405_v16 = vld [vmem:[%s5205_s18 + $0x2b4] sm:$0xf0]  ;;  %v3626_v17 = vld [vmem:[%s5205_s18 + $0x3a8] sm:$0xf] }
  0xdc   : > { %2214 = vmatpush.bf16.msrb.mxu3 %v4087_v23  ;;  %v3499_v23 = vor.u32 %v4405_v16, %v3498_v15  ;;  %v3354_v26 = vld [vmem:[%s5205_s18 + $0x188] sm:$0xf]  ;;  %v3627_v27 = vor.u32 %v4437_v18, %v3626_v17  ;;  %v4369_v28 = vld [vmem:[%s5205_s18 + $0x194] sm:$0xf0] }
  0xdd   : > { %2176 = vmatpush.bf16.msrb.mxu0 %v3687_v29  ;;  %v3482_v29 = vld [vmem:[%s5205_s18 + $0x288] sm:$0xf]  ;;  %v4401_v30 = vld [vmem:[%s5205_s18 + $0x294] sm:$0xf0]  ;;  %v3355_v34 = vor.u32 %v4369_v28, %v3354_v26 }
  0xde   : > { %v3610_v31 = vld [vmem:[%s5205_s18 + $0x388] sm:$0xf]  ;;  %v3483_v35 = vor.u32 %v4401_v30, %v3482_v29  ;;  %v4365_v41 = vld [vmem:[%s5205_s18 + $0x174] sm:$0xf0] }
  0xdf   : > { %2189 = vmatpush.bf16.msrb.mxu1 %v3815_v32  ;;  %2202 = vmatpush.bf16.msrb.mxu2 %v3943_v33  ;;  %v4433_v32 = vld [vmem:[%s5205_s18 + $0x394] sm:$0xf0]  ;;  %v3227_v33 = vor.u32 %v4337_v25, %v3226_v24  ;;  %v3210_v36 = vld [vmem:[%s5205_s18 + $0x68] sm:$0xf] }
  0xe0   : > { %2215 = vmatpush.bf16.msrb.mxu3 %v4071_v37  ;;  %v4333_v37 = vld [vmem:[%s5205_s18 + $0x74] sm:$0xf0]  ;;  %v3338_v38 = vld [vmem:[%s5205_s18 + $0x168] sm:$0xf]  ;;  %v3611_v40 = vor.u32 %v4433_v32, %v3610_v31 }
  0xe1   : > { %2177 = vmatpush.bf16.msrb.mxu0 %v3671_v48  ;;  %v3466_v44 = vld [vmem:[%s5205_s18 + $0x268] sm:$0xf]  ;;  %v4397_v46 = vld [vmem:[%s5205_s18 + $0x274] sm:$0xf0]  ;;  %v3211_v49 = vor.u32 %v4333_v37, %v3210_v36  ;;  %v3339_v50 = vor.u32 %v4365_v41, %v3338_v38 }
  0xe2   : > { %v3594_v47 = vld [vmem:[%s5205_s18 + $0x368] sm:$0xf]  ;;  %v4429_v48 = vld [vmem:[%s5205_s18 + $0x374] sm:$0xf0]  ;;  %v3467_v51 = vor.u32 %v4397_v46, %v3466_v44 }
  0xe3   : > { %2190 = vmatpush.bf16.msrb.mxu1 %v3799_v52  ;;  %2203 = vmatpush.bf16.msrb.mxu2 %v3927_v53  ;;  %v3194_v52 = vld [vmem:[%s5205_s18 + $0x48] sm:$0xf]  ;;  %v4329_v53 = vld [vmem:[%s5205_s18 + $0x54] sm:$0xf0]  ;;  %v3595_v55 = vor.u32 %v4429_v48, %v3594_v47 }
  0xe4   : > { %2216 = vmatpush.bf16.msrb.mxu3 %v4055_v56  ;;  %2178 = vmatmul.bf16.vlgmr.msrb.gmra.mxu0 %v5387_v42  ;;  %v3322_v54 = vld [vmem:[%s5205_s18 + $0x148] sm:$0xf]  ;;  %v4361_v56 = vld [vmem:[%s5205_s18 + $0x154] sm:$0xf0]  ;;  %v3195_v61 = vor.u32 %v4329_v53, %v3194_v52 }
  0xe5   : > { %2222 = vmatpush.bf16.msra.mxu0 %v3275_v57  ;;  %v3450_v57 = vld [vmem:[%s5205_s18 + $0x248] sm:$0xf]  ;;  %v4425_v60 = vld [vmem:[%s5205_s18 + $0x354] sm:$0xf0]  ;;  %v3323_v62 = vor.u32 %v4361_v56, %v3322_v54 }
  0xe6   : > { %2204 = vmatmul.bf16.vlgmr.msrb.gmra.mxu2 %v5383_v39  ;;  %2191 = vmatmul.bf16.vlgmr.msrb.gmra.mxu1 %v5391_v45  ;;  %v3178_v0 = vld [vmem:[%s5205_s18 + $0x28] sm:$0xf]  ;;  %v4325_v1 = vld [vmem:[%s5205_s18 + $0x34] sm:$0xf0] }
  0xe7   : > { %2235 = vmatpush.bf16.msra.mxu1 %v3403_v58  ;;  %2248 = vmatpush.bf16.msra.mxu2 %v3531_v59  ;;  %v4393_v58 = vld [vmem:[%s5205_s18 + $0x254] sm:$0xf0]  ;;  %v3578_v59 = vld [vmem:[%s5205_s18 + $0x348] sm:$0xf]  ;;  %v3179_v11 = vor.u32 %v4325_v1, %v3178_v0 }
  0xe8   : > { %2261 = vmatpush.bf16.msra.mxu3 %v3659_v63  ;;  %v3451_v63 = vor.u32 %v4393_v58, %v3450_v57  ;;  %v3306_v2 = vld [vmem:[%s5205_s18 + $0x128] sm:$0xf]  ;;  %v3579_v3 = vor.u32 %v4425_v60, %v3578_v59  ;;  %v4357_v4 = vld [vmem:[%s5205_s18 + $0x134] sm:$0xf0] }
  0xe9   : > { %2217 = vmatmul.bf16.vlgmr.msrb.gmra.mxu3 %v5389_v43  ;;  %2223 = vmatpush.bf16.msra.mxu0 %v3259_v6  ;;  %v3434_v6 = vld [vmem:[%s5205_s18 + $0x228] sm:$0xf]  ;;  %v4421_v10 = vld [vmem:[%s5205_s18 + $0x334] sm:$0xf0]  ;;  %v3307_v14 = vor.u32 %v4357_v4, %v3306_v2 }
  0xea   : > { %v3162_v12 = vld [vmem:[%s5205_s18 + $0x8] sm:$0xf]  ;;  %v4353_v17 = vld [vmem:[%s5205_s18 + $0x114] sm:$0xf0] }
  0xeb   : > { %2236 = vmatpush.bf16.msra.mxu1 %v3387_v8  ;;  %2249 = vmatpush.bf16.msra.mxu2 %v3515_v9  ;;  %v4389_v8 = vld [vmem:[%s5205_s18 + $0x234] sm:$0xf0]  ;;  %v3562_v9 = vld [vmem:[%s5205_s18 + $0x328] sm:$0xf] }
  0xec   : > { %2262 = vmatpush.bf16.msra.mxu3 %v3643_v13  ;;  %v4321_v13 = vld [vmem:[%s5205_s18 + $0x14] sm:$0xf0]  ;;  %v3435_v15 = vor.u32 %v4389_v8, %v3434_v6  ;;  %v3290_v16 = vld [vmem:[%s5205_s18 + $0x108] sm:$0xf] }
  0xed   : > { %2224 = vmatpush.bf16.msra.mxu0 %v3243_v19  ;;  %v3418_v18 = vld [vmem:[%s5205_s18 + $0x208] sm:$0xf]  ;;  %v3563_v19 = vor.u32 %v4421_v10, %v3562_v9  ;;  %v4417_v24 = vld [vmem:[%s5205_s18 + $0x314] sm:$0xf0]  ;;  %v3163_v28 = vor.u32 %v4321_v13, %v3162_v12  ;;  %v3291_v32 = vor.u32 %v4353_v17, %v3290_v16 }
  0xee   : > { %v3786_v25 = vld [vmem:[%s5205_s18 + $0x4e8] sm:$0xf]  ;;  %v4477_v26 = vld [vmem:[%s5205_s18 + $0x4f4] sm:$0xf0] }
  0xef   : > { %2237 = vmatpush.bf16.msra.mxu1 %v3371_v20  ;;  %2250 = vmatpush.bf16.msra.mxu2 %v3499_v23  ;;  %v4385_v20 = vld [vmem:[%s5205_s18 + $0x214] sm:$0xf0]  ;;  %v3546_v23 = vld [vmem:[%s5205_s18 + $0x308] sm:$0xf]  ;;  %v3787_v37 = vor.u32 %v4477_v26, %v3786_v25 }
  0xf0   : > { %2263 = vmatpush.bf16.msra.mxu3 %v3627_v27  ;;  %v3914_v27 = vld [vmem:[%s5205_s18 + $0x5e8] sm:$0xf]  ;;  %v4509_v29 = vld [vmem:[%s5205_s18 + $0x5f4] sm:$0xf0]  ;;  %v3547_v36 = vor.u32 %v4417_v24, %v3546_v23 }
  0xf1   : > { %2225 = vmatpush.bf16.msra.mxu0 %v3227_v33  ;;  %v4042_v30 = vld [vmem:[%s5205_s18 + $0x6e8] sm:$0xf]  ;;  %v4541_v31 = vld [vmem:[%s5205_s18 + $0x6f4] sm:$0xf0]  ;;  %v3419_v33 = vor.u32 %v4385_v20, %v3418_v18  ;;  %v3915_v38 = vor.u32 %v4509_v29, %v3914_v27 }
  0xf2   : > { %v3770_v41 = vld [vmem:[%s5205_s18 + $0x4c8] sm:$0xf]  ;;  %v4473_v44 = vld [vmem:[%s5205_s18 + $0x4d4] sm:$0xf0] }
  0xf3   : > { %2238 = vmatpush.bf16.msra.mxu1 %v3355_v34  ;;  %2251 = vmatpush.bf16.msra.mxu2 %v3483_v35  ;;  %v4170_v34 = vld [vmem:[%s5205_s18 + $0x7e8] sm:$0xf]  ;;  %v4573_v35 = vld [vmem:[%s5205_s18 + $0x7f4] sm:$0xf0]  ;;  %v3771_v53 = vor.u32 %v4473_v44, %v3770_v41 }
  0xf4   : > { %2264 = vmatpush.bf16.msra.mxu3 %v3611_v40  ;;  %v4043_v40 = vor.u32 %v4541_v31, %v4042_v30  ;;  %v3898_v46 = vld [vmem:[%s5205_s18 + $0x5c8] sm:$0xf]  ;;  %v4171_v47 = vor.u32 %v4573_v35, %v4170_v34  ;;  %v4505_v48 = vld [vmem:[%s5205_s18 + $0x5d4] sm:$0xf0] }
  0xf5   : > { %2226 = vmatpush.bf16.msra.mxu0 %v3211_v49  ;;  %v4026_v49 = vld [vmem:[%s5205_s18 + $0x6c8] sm:$0xf]  ;;  %v4569_v52 = vld [vmem:[%s5205_s18 + $0x7d4] sm:$0xf0]  ;;  %v3899_v54 = vor.u32 %v4505_v48, %v3898_v46 }
  0xf6   : > { %v3754_v56 = vld [vmem:[%s5205_s18 + $0x4a8] sm:$0xf]  ;;  %v4469_v57 = vld [vmem:[%s5205_s18 + $0x4b4] sm:$0xf0] }
  0xf7   : > { %2239 = vmatpush.bf16.msra.mxu1 %v3339_v50  ;;  %2252 = vmatpush.bf16.msra.mxu2 %v3467_v51  ;;  %v4537_v50 = vld [vmem:[%s5205_s18 + $0x6d4] sm:$0xf0]  ;;  %v4154_v51 = vld [vmem:[%s5205_s18 + $0x7c8] sm:$0xf]  ;;  %v3755_v1 = vor.u32 %v4469_v57, %v3754_v56 }
  0xf8   : > { %2265 = vmatpush.bf16.msra.mxu3 %v3595_v55  ;;  %v4027_v55 = vor.u32 %v4537_v50, %v4026_v49  ;;  %v3882_v58 = vld [vmem:[%s5205_s18 + $0x5a8] sm:$0xf]  ;;  %v4155_v59 = vor.u32 %v4569_v52, %v4154_v51  ;;  %v4501_v60 = vld [vmem:[%s5205_s18 + $0x5b4] sm:$0xf0] }
  0xf9   : > { %2227 = vmatpush.bf16.msra.mxu0 %v3195_v61  ;;  %v4010_v61 = vld [vmem:[%s5205_s18 + $0x6a8] sm:$0xf]  ;;  %v4565_v0 = vld [vmem:[%s5205_s18 + $0x7b4] sm:$0xf0]  ;;  %v3883_v2 = vor.u32 %v4501_v60, %v3882_v58 }
  0xfa   : > { %v3738_v4 = vld [vmem:[%s5205_s18 + $0x488] sm:$0xf]  ;;  %v4465_v6 = vld [vmem:[%s5205_s18 + $0x494] sm:$0xf0] }
  0xfb   : > { %2240 = vmatpush.bf16.msra.mxu1 %v3323_v62  ;;  %2253 = vmatpush.bf16.msra.mxu2 %v3451_v63  ;;  %v4533_v62 = vld [vmem:[%s5205_s18 + $0x6b4] sm:$0xf0]  ;;  %v4138_v63 = vld [vmem:[%s5205_s18 + $0x7a8] sm:$0xf] }
  0xfc   : > { %2266 = vmatpush.bf16.msra.mxu3 %v3579_v3  ;;  %v4011_v3 = vor.u32 %v4533_v62, %v4010_v61  ;;  %v3866_v8 = vld [vmem:[%s5205_s18 + $0x588] sm:$0xf]  ;;  %v4139_v9 = vor.u32 %v4565_v0, %v4138_v63  ;;  %v4497_v10 = vld [vmem:[%s5205_s18 + $0x594] sm:$0xf0] }
  0xfd   : > { %2228 = vmatpush.bf16.msra.mxu0 %v3179_v11  ;;  %v3994_v11 = vld [vmem:[%s5205_s18 + $0x688] sm:$0xf]  ;;  %v4529_v12 = vld [vmem:[%s5205_s18 + $0x694] sm:$0xf0]  ;;  %v3867_v16 = vor.u32 %v4497_v10, %v3866_v8 }
  0xfe   : > { %v4122_v13 = vld [vmem:[%s5205_s18 + $0x788] sm:$0xf]  ;;  %v3995_v17 = vor.u32 %v4529_v12, %v3994_v11  ;;  %v4493_v24 = vld [vmem:[%s5205_s18 + $0x574] sm:$0xf0]  ;;  %v4347_v11 = vld [vmem:[%s5205_s18 + $0xec] sm:$0xf] }
  0xff   : > { %2241 = vmatpush.bf16.msra.mxu1 %v3307_v14  ;;  %2254 = vmatpush.bf16.msra.mxu2 %v3435_v15  ;;  %v4561_v14 = vld [vmem:[%s5205_s18 + $0x794] sm:$0xf0]  ;;  %v3739_v15 = vor.u32 %v4465_v6, %v3738_v4  ;;  %v3722_v18 = vld [vmem:[%s5205_s18 + $0x468] sm:$0xf]  ;;  %v3276_v12 = vld [vmem:[%s5205_s18 + $0xf8] sm:$0xf0] }
 0x100   : > { %2267 = vmatpush.bf16.msra.mxu3 %v3563_v19  ;;  %v4461_v19 = vld [vmem:[%s5205_s18 + $0x474] sm:$0xf0]  ;;  %v3850_v20 = vld [vmem:[%s5205_s18 + $0x568] sm:$0xf]  ;;  %v4123_v23 = vor.u32 %v4561_v14, %v4122_v13  ;;  %v4379_v13 = vld [vmem:[%s5205_s18 + $0x1ec] sm:$0xf] }
 0x101   : > { %2229 = vmatpush.bf16.msra.mxu0 %v3163_v28  ;;  %v3978_v25 = vld [vmem:[%s5205_s18 + $0x668] sm:$0xf]  ;;  %v4525_v26 = vld [vmem:[%s5205_s18 + $0x674] sm:$0xf0]  ;;  %v3723_v29 = vor.u32 %v4461_v19, %v3722_v18  ;;  %v3851_v30 = vor.u32 %v4493_v24, %v3850_v20  ;;  %v3532_v18 = vld [vmem:[%s5205_s18 + $0x2f8] sm:$0xf0] }
 0x102   : > { %v4106_v27 = vld [vmem:[%s5205_s18 + $0x768] sm:$0xf]  ;;  %v4557_v28 = vld [vmem:[%s5205_s18 + $0x774] sm:$0xf0]  ;;  %v3979_v31 = vor.u32 %v4525_v26, %v3978_v25  ;;  %v4443_v24 = vld [vmem:[%s5205_s18 + $0x3ec] sm:$0xf] }
 0x103   : > { %2242 = vmatpush.bf16.msra.mxu1 %v3291_v32  ;;  %2255 = vmatpush.bf16.msra.mxu2 %v3419_v33  ;;  %v3706_v32 = vld [vmem:[%s5205_s18 + $0x448] sm:$0xf]  ;;  %v4457_v33 = vld [vmem:[%s5205_s18 + $0x454] sm:$0xf0]  ;;  %v4107_v35 = vor.u32 %v4557_v28, %v4106_v27  ;;  %v3660_v25 = vld [vmem:[%s5205_s18 + $0x3f8] sm:$0xf0]  ;;  %v3279_v28 = vor.u32 %v4347_v11, %v3276_v12 }
 0x104   : > { %2268 = vmatpush.bf16.msra.mxu3 %v3547_v36  ;;  %2230 = vmatmul.bf16.vlgmr.msra.gmra.mxu0 %v5328_v21  ;;  %v3834_v34 = vld [vmem:[%s5205_s18 + $0x548] sm:$0xf]  ;;  %v4489_v36 = vld [vmem:[%s5205_s18 + $0x554] sm:$0xf0]  ;;  %v3707_v46 = vor.u32 %v4457_v33, %v3706_v32  ;;  %v4343_v33 = vld [vmem:[%s5205_s18 + $0xcc] sm:$0xf] }
 0x105   : > { %2274 = vmatpush.bf16.msrb.mxu0 %v3787_v37  ;;  %v3962_v37 = vld [vmem:[%s5205_s18 + $0x648] sm:$0xf]  ;;  %v4553_v41 = vld [vmem:[%s5205_s18 + $0x754] sm:$0xf0]  ;;  %v3835_v48 = vor.u32 %v4489_v36, %v3834_v34  ;;  %v3260_v34 = vld [vmem:[%s5205_s18 + $0xd8] sm:$0xf0]  ;;  %v3663_v36 = vor.u32 %v4443_v24, %v3660_v25 }
 0x106   : > { %2256 = vmatmul.bf16.vlgmr.msra.gmra.mxu2 %v5314_v5  ;;  %2243 = vmatmul.bf16.vlgmr.msra.gmra.mxu1 %v5331_v22  ;;  %v3690_v50 = vld [vmem:[%s5205_s18 + $0x428] sm:$0xf]  ;;  %v4453_v51 = vld [vmem:[%s5205_s18 + $0x434] sm:$0xf0]  ;;  %v3468_v24 = vld [vmem:[%s5205_s18 + $0x278] sm:$0xf0] }
 0x107   : > { %2287 = vmatpush.bf16.msrb.mxu1 %v3915_v38  ;;  %2300 = vmatpush.bf16.msrb.mxu2 %v4043_v40  ;;  %v4521_v38 = vld [vmem:[%s5205_s18 + $0x654] sm:$0xf0]  ;;  %v4090_v40 = vld [vmem:[%s5205_s18 + $0x748] sm:$0xf]  ;;  %v3691_v61 = vor.u32 %v4453_v51, %v3690_v50  ;;  %v4339_v50 = vld [vmem:[%s5205_s18 + $0xac] sm:$0xf] }
 0x108   : > { %2313 = vmatpush.bf16.msrb.mxu3 %v4171_v47  ;;  %v3963_v49 = vor.u32 %v4521_v38, %v3962_v37  ;;  %v3818_v52 = vld [vmem:[%s5205_s18 + $0x528] sm:$0xf]  ;;  %v4517_v57 = vld [vmem:[%s5205_s18 + $0x634] sm:$0xf0]  ;;  %v3388_v37 = vld [vmem:[%s5205_s18 + $0x1d8] sm:$0xf0] }
 0x109   : > { %2269 = vmatmul.bf16.vlgmr.msra.gmra.mxu3 %v5317_v7  ;;  %2275 = vmatpush.bf16.msrb.mxu0 %v3771_v53  ;;  %v5636_v53 = vpop.f32.mrf.mxu2  ;;  %v3946_v56 = vld [vmem:[%s5205_s18 + $0x628] sm:$0xf]  ;;  %v5641_v58 = vpop.f32.mrf.mxu3  ;;  %v4549_v60 = vld [vmem:[%s5205_s18 + $0x734] sm:$0xf0]  ;;  %v4407_v38 = vld [vmem:[%s5205_s18 + $0x2cc] sm:$0xf] }
 0x10a   : > { %v3674_v62 = vld [vmem:[%s5205_s18 + $0x408] sm:$0xf]  ;;  %v4449_v63 = vld [vmem:[%s5205_s18 + $0x414] sm:$0xf0]  ;;  %v3244_v51 = vld [vmem:[%s5205_s18 + $0xb8] sm:$0xf0] }
 0x10b   : > { %2288 = vmatpush.bf16.msrb.mxu1 %v3899_v54  ;;  %2301 = vmatpush.bf16.msrb.mxu2 %v4027_v55  ;;  %v4091_v54 = vor.u32 %v4553_v41, %v4090_v40  ;;  %v4485_v55 = vld [vmem:[%s5205_s18 + $0x534] sm:$0xf0]  ;;  %v3930_v4 = vld [vmem:[%s5205_s18 + $0x608] sm:$0xf]  ;;  %v3516_v40 = vld [vmem:[%s5205_s18 + $0x2d8] sm:$0xf0] }
 0x10c   : > { %2314 = vmatpush.bf16.msrb.mxu3 %v4155_v59  ;;  %v4074_v59 = vld [vmem:[%s5205_s18 + $0x728] sm:$0xf]  ;;  %v3819_v0 = vor.u32 %v4485_v55, %v3818_v52  ;;  %v4513_v8 = vld [vmem:[%s5205_s18 + $0x614] sm:$0xf0]  ;;  %v4439_v41 = vld [vmem:[%s5205_s18 + $0x3cc] sm:$0xf] }
 0x10d   : > { %2276 = vmatpush.bf16.msrb.mxu0 %v3755_v1  ;;  %v3947_v1 = vor.u32 %v4517_v57, %v3946_v56  ;;  %v4075_v6 = vor.u32 %v4549_v60, %v4074_v59  ;;  %v4545_v10 = vld [vmem:[%s5205_s18 + $0x714] sm:$0xf0]  ;;  %v4371_v52 = vld [vmem:[%s5205_s18 + $0x1ac] sm:$0xf]  ;;  %v3372_v55 = vld [vmem:[%s5205_s18 + $0x1b8] sm:$0xf0]  ;;  %v3247_v60 = vor.u32 %v4339_v50, %v3244_v51 }
 0x10e   : > { %v4403_v56 = vld [vmem:[%s5205_s18 + $0x2ac] sm:$0xf]  ;;  %v3500_v57 = vld [vmem:[%s5205_s18 + $0x2b8] sm:$0xf0] }
 0x10f   : > { %2289 = vmatpush.bf16.msrb.mxu1 %v3883_v2  ;;  %2302 = vmatpush.bf16.msrb.mxu2 %v4011_v3  ;;  %v2023_v44 = vpop.f32.mrf.mxu0  ;;  %v2036_v47 = vpop.f32.mrf.mxu1  ;;  %v3802_v2 = vld [vmem:[%s5205_s18 + $0x508] sm:$0xf]  ;;  %v4481_v3 = vld [vmem:[%s5205_s18 + $0x514] sm:$0xf0]  ;;  %v4435_v59 = vld [vmem:[%s5205_s18 + $0x3ac] sm:$0xf] }
 0x110   : > { %2315 = vmatpush.bf16.msrb.mxu3 %v4139_v9  ;;  %v4058_v9 = vld [vmem:[%s5205_s18 + $0x708] sm:$0xf]  ;;  %v3803_v20 = vor.u32 %v4481_v3, %v3802_v2  ;;  %v2037_v32 = vadd.f32 %v2036_v47, %v2023_v44  ;;  %v3263_v44 = vor.u32 %v4343_v33, %v3260_v34  ;;  %v4367_v2 = vld [vmem:[%s5205_s18 + $0x18c] sm:$0xf] }
 0x111   : > { %2277 = vmatpush.bf16.msrb.mxu0 %v3739_v15  ;;  %v3675_v15 = vor.u32 %v4449_v63, %v3674_v62  ;;  %v2051_v26 = vpop.f32.mrf.mxu2  ;;  %v4059_v27 = vor.u32 %v4545_v10, %v4058_v9  ;;  %v3375_v62 = vor.u32 %v4371_v52, %v3372_v55  ;;  %v3503_v63 = vor.u32 %v4403_v56, %v3500_v57  ;;  %v4431_v9 = vld [vmem:[%s5205_s18 + $0x38c] sm:$0xf]  ;;  %v3612_v10 = vld [vmem:[%s5205_s18 + $0x398] sm:$0xf0] }
 0x112   : > { %v4427_v25 = vld [vmem:[%s5205_s18 + $0x36c] sm:$0xf]  ;;  %v3596_v26 = vld [vmem:[%s5205_s18 + $0x378] sm:$0xf0] }
 0x113   : > { %2290 = vmatpush.bf16.msrb.mxu1 %v3867_v16  ;;  %2303 = vmatpush.bf16.msrb.mxu2 %v3995_v17  ;;  %v3404_v16 = vld [vmem:[%s5205_s18 + $0x1f8] sm:$0xf0]  ;;  %v4411_v17 = vld [vmem:[%s5205_s18 + $0x2ec] sm:$0xf] }
 0x114   : > { %2316 = vmatpush.bf16.msrb.mxu3 %v4123_v23  ;;  %v3931_v23 = vor.u32 %v4513_v8, %v3930_v4  ;;  %v3356_v4 = vld [vmem:[%s5205_s18 + $0x198] sm:$0xf0]  ;;  %v4359_v33 = vld [vmem:[%s5205_s18 + $0x14c] sm:$0xf] }
 0x115   : > { %2278 = vmatpush.bf16.msrb.mxu0 %v3723_v29  ;;  %v2064_v29 = vpop.f32.mrf.mxu3  ;;  %v3484_v8 = vld [vmem:[%s5205_s18 + $0x298] sm:$0xf0]  ;;  %v3359_v12 = vor.u32 %v4367_v2, %v3356_v4  ;;  %v4355_v56 = vld [vmem:[%s5205_s18 + $0x12c] sm:$0xf] }
 0x116   : > { %v3180_v55 = vld [vmem:[%s5205_s18 + $0x38] sm:$0xf0]  ;;  %v4319_v2 = vld [vmem:[%s5205_s18 + $0xc] sm:$0xf] }
 0x117   : > { %2291 = vmatpush.bf16.msrb.mxu1 %v3851_v30  ;;  %2304 = vmatpush.bf16.msrb.mxu2 %v3979_v31  ;;  %v2025_v14 = vpop.f32.mrf.mxu0  ;;  %v2038_v19 = vpop.f32.mrf.mxu1  ;;  %v3407_v30 = vor.u32 %v4379_v13, %v3404_v16  ;;  %v3535_v31 = vor.u32 %v4411_v17, %v3532_v18  ;;  %v4363_v16 = vld [vmem:[%s5205_s18 + $0x16c] sm:$0xf] }
 0x118   : > { %2317 = vmatpush.bf16.msrb.mxu3 %v4107_v35  ;;  %v4375_v35 = vld [vmem:[%s5205_s18 + $0x1cc] sm:$0xf]  ;;  %v3615_v19 = vor.u32 %v4431_v9, %v3612_v10  ;;  %v3292_v9 = vld [vmem:[%s5205_s18 + $0x118] sm:$0xf0] }
 0x119   : > { %2279 = vmatpush.bf16.msrb.mxu0 %v3707_v46  ;;  %v3644_v46 = vld [vmem:[%s5205_s18 + $0x3d8] sm:$0xf0]  ;;  %v3391_v47 = vor.u32 %v4375_v35, %v3388_v37  ;;  %v4331_v14 = vld [vmem:[%s5205_s18 + $0x6c] sm:$0xf]  ;;  %v3599_v35 = vor.u32 %v4427_v25, %v3596_v26 }
 0x11a   : > { %v4391_v37 = vld [vmem:[%s5205_s18 + $0x24c] sm:$0xf] }
 0x11b   : > { %2292 = vmatpush.bf16.msrb.mxu1 %v3835_v48  ;;  %2305 = vmatpush.bf16.msrb.mxu2 %v3963_v49  ;;  %v3519_v48 = vor.u32 %v4407_v38, %v3516_v40  ;;  %v2050_v49 = vadd.f32 %v5636_v53, %v2037_v32  ;;  %v3628_v53 = vld [vmem:[%s5205_s18 + $0x3b8] sm:$0xf0]  ;;  %v4383_v10 = vld [vmem:[%s5205_s18 + $0x20c] sm:$0xf] }
 0x11c   : > { %2318 = vmatpush.bf16.msrb.mxu3 %v4091_v54  ;;  %v3647_v54 = vor.u32 %v4439_v41, %v3644_v46  ;;  %v3631_v3 = vor.u32 %v4435_v59, %v3628_v53  ;;  %v3196_v32 = vld [vmem:[%s5205_s18 + $0x58] sm:$0xf0]  ;;  %v4423_v46 = vld [vmem:[%s5205_s18 + $0x34c] sm:$0xf] }
 0x11d   : > { %2280 = vmatpush.bf16.msrb.mxu0 %v3691_v61  ;;  %v2063_v61 = vadd.f32 %v5641_v58, %v2050_v49  ;;  %v3452_v38 = vld [vmem:[%s5205_s18 + $0x258] sm:$0xf0] }
 0x11e   : > { %v3455_v52 = vor.u32 %v4391_v37, %v3452_v38  ;;  %v3900_v37 = vld [vmem:[%s5205_s18 + $0x5d8] sm:$0xf0]  ;;  %v4535_v38 = vld [vmem:[%s5205_s18 + $0x6cc] sm:$0xf] }
 0x11f   : > { %2293 = vmatpush.bf16.msrb.mxu1 %v3819_v0  ;;  %2306 = vmatpush.bf16.msrb.mxu2 %v3947_v1  ;;  %v4335_v0 = vld [vmem:[%s5205_s18 + $0x8c] sm:$0xf]  ;;  %v3228_v1 = vld [vmem:[%s5205_s18 + $0x98] sm:$0xf0] }
 0x120   : > { %2319 = vmatpush.bf16.msrb.mxu3 %v4075_v6  ;;  %v4399_v6 = vld [vmem:[%s5205_s18 + $0x28c] sm:$0xf]  ;;  %v3231_v58 = vor.u32 %v4335_v0, %v3228_v1  ;;  %v3564_v0 = vld [vmem:[%s5205_s18 + $0x338] sm:$0xf0] }
 0x121   : > { %2281 = vmatpush.bf16.msrb.mxu0 %v3675_v15  ;;  %v3487_v13 = vor.u32 %v4399_v6, %v3484_v8  ;;  %v3212_v15 = vld [vmem:[%s5205_s18 + $0x78] sm:$0xf0]  ;;  %v4351_v8 = vld [vmem:[%s5205_s18 + $0x10c] sm:$0xf] }
 0x122   : > { %v3295_v25 = vor.u32 %v4351_v8, %v3292_v9  ;;  %v4459_v9 = vld [vmem:[%s5205_s18 + $0x46c] sm:$0xf] }
 0x123   : > { %2294 = vmatpush.bf16.msrb.mxu1 %v3803_v20  ;;  %2307 = vmatpush.bf16.msrb.mxu2 %v3931_v23  ;;  %v2075_v11 = vpop.f32.mrf.mxu0  ;;  %v3340_v20 = vld [vmem:[%s5205_s18 + $0x178] sm:$0xf0]  ;;  %v4395_v23 = vld [vmem:[%s5205_s18 + $0x26c] sm:$0xf] }
 0x124   : > { %2320 = vmatpush.bf16.msrb.mxu3 %v4059_v27  ;;  %2282 = vmatmul.bf16.vlgmr.msrb.gmra.mxu0 %v5387_v42  ;;  %v2076_v17 = vadd.f32 %v2075_v11, %v2063_v61  ;;  %v3343_v29 = vor.u32 %v4363_v16, %v3340_v20  ;;  %v4387_v61 = vld [vmem:[%s5205_s18 + $0x22c] sm:$0xf]  ;;  %v3916_v20 = vld [vmem:[%s5205_s18 + $0x5f8] sm:$0xf0] }
 0x125   : > { %2326 = vmatpush.bf16.msra.mxu0 %v3279_v28  ;;  %v2088_v18 = vpop.f32.mrf.mxu1  ;;  %v3215_v28 = vor.u32 %v4331_v14, %v3212_v15  ;;  %v3548_v14 = vld [vmem:[%s5205_s18 + $0x318] sm:$0xf0]  ;;  %v4475_v16 = vld [vmem:[%s5205_s18 + $0x4ec] sm:$0xf] }
 0x126   : > { %2308 = vmatmul.bf16.vlgmr.msrb.gmra.mxu2 %v5383_v39  ;;  %2295 = vmatmul.bf16.vlgmr.msrb.gmra.mxu1 %v5391_v45  ;;  %v2089_v27 = vadd.f32 %v2088_v18, %v2076_v17  ;;  %v3788_v17 = vld [vmem:[%s5205_s18 + $0x4f8] sm:$0xf0]  ;;  %v4507_v18 = vld [vmem:[%s5205_s18 + $0x5ec] sm:$0xf] }
 0x127   : > { %2339 = vmatpush.bf16.msra.mxu1 %v3407_v30  ;;  %2352 = vmatpush.bf16.msra.mxu2 %v3535_v31  ;;  %v3471_v30 = vor.u32 %v4395_v23, %v3468_v24  ;;  %v4327_v31 = vld [vmem:[%s5205_s18 + $0x4c] sm:$0xf]  ;;  %v4044_v24 = vld [vmem:[%s5205_s18 + $0x6f8] sm:$0xf0] }
 0x128   : > { %2365 = vmatpush.bf16.msra.mxu3 %v3663_v36  ;;  %v3324_v36 = vld [vmem:[%s5205_s18 + $0x158] sm:$0xf0]  ;;  %v4539_v23 = vld [vmem:[%s5205_s18 + $0x6ec] sm:$0xf] }
 0x129   : > { %2321 = vmatmul.bf16.vlgmr.msrb.gmra.mxu3 %v5389_v43  ;;  %2327 = vmatpush.bf16.msra.mxu0 %v3263_v44  ;;  %v2101_v34 = vpop.f32.mrf.mxu2  ;;  %v3580_v44 = vld [vmem:[%s5205_s18 + $0x358] sm:$0xf0]  ;;  %v3327_v51 = vor.u32 %v4359_v33, %v3324_v36  ;;  %v4471_v33 = vld [vmem:[%s5205_s18 + $0x4cc] sm:$0xf] }
 0x12a   : > { %v2102_v40 = vadd.f32 %v2101_v34, %v2089_v27  ;;  %v3583_v59 = vor.u32 %v4423_v46, %v3580_v44  ;;  %v4571_v27 = vld [vmem:[%s5205_s18 + $0x7ec] sm:$0xf]  ;;  %v3772_v34 = vld [vmem:[%s5205_s18 + $0x4d8] sm:$0xf0] }
 0x12b   : > { %2340 = vmatpush.bf16.msra.mxu1 %v3391_v47  ;;  %2353 = vmatpush.bf16.msra.mxu2 %v3519_v48  ;;  %v442_v47 = vld [vmem:[#allocation2 + $0x10] sm:$0xff]  ;;  %v3199_v48 = vor.u32 %v4327_v31, %v3196_v32  ;;  %v2077_v50 = vpop.f32.mrf.mxu0  ;;  %v3919_v31 = vor.u32 %v4507_v18, %v3916_v20  ;;  %v4047_v32 = vor.u32 %v4539_v23, %v4044_v24  ;;  %v4156_v46 = vld [vmem:[%s5205_s18 + $0x7d8] sm:$0xf0]  ;;  %v4455_v23 = vld [vmem:[%s5205_s18 + $0x44c] sm:$0xf] }
 0x12c   : > { %2366 = vmatpush.bf16.msra.mxu3 %v3647_v54  ;;  %v2114_v41 = vpop.f32.mrf.mxu3  ;;  %v4323_v54 = vld [vmem:[%s5205_s18 + $0x2c] sm:$0xf]  ;;  %v3775_v44 = vor.u32 %v4471_v33, %v3772_v34  ;;  %v3756_v50 = vld [vmem:[%s5205_s18 + $0x4b8] sm:$0xf0] }
 0x12d   : > { %2328 = vmatpush.bf16.msra.mxu0 %v3247_v60  ;;  %v2115_v49 = vadd.f32 %v2114_v41, %v2102_v40  ;;  %v2090_v57 = vpop.f32.mrf.mxu1  ;;  %v3308_v60 = vld [vmem:[%s5205_s18 + $0x138] sm:$0xf0]  ;;  %v3183_v1 = vor.u32 %v4323_v54, %v3180_v55  ;;  %v4567_v41 = vld [vmem:[%s5205_s18 + $0x7cc] sm:$0xf] }
 0x12e   : > { %v3311_v4 = vor.u32 %v4355_v56, %v3308_v60  ;;  %v4028_v40 = vld [vmem:[%s5205_s18 + $0x6d8] sm:$0xf0]  ;;  %v4531_v55 = vld [vmem:[%s5205_s18 + $0x6ac] sm:$0xf] }
 0x12f   : > { %2341 = vmatpush.bf16.msra.mxu1 %v3375_v62  ;;  %2354 = vmatpush.bf16.msra.mxu2 %v3503_v63  ;;  %v2430_v53 = vadd.f32 %v2115_v49, %v442_v47  ;;  %v3436_v62 = vld [vmem:[%s5205_s18 + $0x238] sm:$0xf0]  ;;  %v4419_v63 = vld [vmem:[%s5205_s18 + $0x32c] sm:$0xf] }
 0x130   : > { %2367 = vmatpush.bf16.msra.mxu3 %v3631_v3  ;;  %v3164_v3 = vld [vmem:[%s5205_s18 + $0x18] sm:$0xf0]  ;;  %v3439_v6 = vor.u32 %v4387_v61, %v3436_v62  ;;  %v3567_v11 = vor.u32 %v4419_v63, %v3564_v0  ;;  %v4467_v49 = vld [vmem:[%s5205_s18 + $0x4ac] sm:$0xf] }
 0x131   : > { %2329 = vmatpush.bf16.msra.mxu0 %v3231_v58  ;;  %2434 = vst [vmem:[#allocation2 + $0x10] sm:$0xff] %v2430_v53  ;;  %v2103_v58 = vpop.f32.mrf.mxu2  ;;  %v3884_v54 = vld [vmem:[%s5205_s18 + $0x5b8] sm:$0xf0]  ;;  %v4563_v57 = vld [vmem:[%s5205_s18 + $0x7ac] sm:$0xf]  ;;  %v3759_v53 = vor.u32 %v4467_v49, %v3756_v50 }
 0x132   : > { %v4012_v56 = vld [vmem:[%s5205_s18 + $0x6b8] sm:$0xf0]  ;;  %v4463_v61 = vld [vmem:[%s5205_s18 + $0x48c] sm:$0xf] }
 0x133   : > { %2342 = vmatpush.bf16.msra.mxu1 %v3359_v12  ;;  %2355 = vmatpush.bf16.msra.mxu2 %v3487_v13  ;;  %v3420_v12 = vld [vmem:[%s5205_s18 + $0x218] sm:$0xf0]  ;;  %v4415_v13 = vld [vmem:[%s5205_s18 + $0x30c] sm:$0xf]  ;;  %v4015_v60 = vor.u32 %v4531_v55, %v4012_v56 }
 0x134   : > { %2368 = vmatpush.bf16.msra.mxu3 %v3615_v19  ;;  %v2116_v15 = vpop.f32.mrf.mxu3  ;;  %v3167_v19 = vor.u32 %v4319_v2, %v3164_v3  ;;  %v3423_v26 = vor.u32 %v4383_v10, %v3420_v12  ;;  %v3740_v62 = vld [vmem:[%s5205_s18 + $0x498] sm:$0xf0]  ;;  %v4559_v2 = vld [vmem:[%s5205_s18 + $0x78c] sm:$0xf] }
 0x135   : > { %2330 = vmatpush.bf16.msra.mxu0 %v3215_v28  ;;  %v4172_v28 = vld [vmem:[%s5205_s18 + $0x7f8] sm:$0xf0]  ;;  %v4491_v58 = vld [vmem:[%s5205_s18 + $0x56c] sm:$0xf] }
 0x136   : > { %v4175_v36 = vor.u32 %v4571_v27, %v4172_v28  ;;  %v3868_v0 = vld [vmem:[%s5205_s18 + $0x598] sm:$0xf0]  ;;  %v4547_v50 = vld [vmem:[%s5205_s18 + $0x72c] sm:$0xf] }
 0x137   : > { %2343 = vmatpush.bf16.msra.mxu1 %v3343_v29  ;;  %2356 = vmatpush.bf16.msra.mxu2 %v3471_v30  ;;  %v3551_v29 = vor.u32 %v4415_v13, %v3548_v14  ;;  %v3791_v30 = vor.u32 %v4475_v16, %v3788_v17  ;;  %v4124_v3 = vld [vmem:[%s5205_s18 + $0x798] sm:$0xf0]  ;;  %v4523_v14 = vld [vmem:[%s5205_s18 + $0x66c] sm:$0xf] }
 0x138   : > { %2369 = vmatpush.bf16.msra.mxu3 %v3599_v35  ;;  %v4503_v35 = vld [vmem:[%s5205_s18 + $0x5cc] sm:$0xf]  ;;  %v3724_v10 = vld [vmem:[%s5205_s18 + $0x478] sm:$0xf0]  ;;  %v4127_v12 = vor.u32 %v4559_v2, %v4124_v3 }
 0x139   : > { %2331 = vmatpush.bf16.msra.mxu0 %v3199_v48  ;;  %v3903_v47 = vor.u32 %v4503_v35, %v3900_v37  ;;  %v4031_v48 = vor.u32 %v4535_v38, %v4028_v40  ;;  %v3852_v13 = vld [vmem:[%s5205_s18 + $0x578] sm:$0xf0]  ;;  %v4555_v16 = vld [vmem:[%s5205_s18 + $0x76c] sm:$0xf]  ;;  %v3727_v18 = vor.u32 %v4459_v9, %v3724_v10 }
 0x13a   : > { %v3980_v15 = vld [vmem:[%s5205_s18 + $0x678] sm:$0xf0]  ;;  %v4451_v38 = vld [vmem:[%s5205_s18 + $0x42c] sm:$0xf] }
 0x13b   : > { %2344 = vmatpush.bf16.msra.mxu1 %v3327_v51  ;;  %2357 = vmatpush.bf16.msra.mxu2 %v3455_v52  ;;  %v4499_v51 = vld [vmem:[%s5205_s18 + $0x5ac] sm:$0xf]  ;;  %v4159_v52 = vor.u32 %v4567_v41, %v4156_v46  ;;  %v4108_v17 = vld [vmem:[%s5205_s18 + $0x778] sm:$0xf0]  ;;  %v3983_v20 = vor.u32 %v4523_v14, %v3980_v15  ;;  %v443_v14 = vld [vmem:[#allocation2] sm:$0xff] }
 0x13c   : > { %2370 = vmatpush.bf16.msra.mxu3 %v3583_v59  ;;  %v4140_v59 = vld [vmem:[%s5205_s18 + $0x7b8] sm:$0xf0]  ;;  %v4111_v27 = vor.u32 %v4555_v16, %v4108_v17  ;;  %v4483_v41 = vld [vmem:[%s5205_s18 + $0x52c] sm:$0xf] }
 0x13d   : > { %2332 = vmatpush.bf16.msra.mxu0 %v3183_v1  ;;  %v4143_v63 = vor.u32 %v4563_v57, %v4140_v59  ;;  %v3996_v1 = vld [vmem:[%s5205_s18 + $0x698] sm:$0xf0]  ;;  %v4447_v56 = vld [vmem:[%s5205_s18 + $0x40c] sm:$0xf] }
 0x13e   : > { %v3708_v24 = vld [vmem:[%s5205_s18 + $0x458] sm:$0xf0]  ;;  %v4479_v59 = vld [vmem:[%s5205_s18 + $0x50c] sm:$0xf] }
 0x13f   : > { %2345 = vmatpush.bf16.msra.mxu1 %v3311_v4  ;;  %2358 = vmatpush.bf16.msra.mxu2 %v3439_v6  ;;  %v3836_v28 = vld [vmem:[%s5205_s18 + $0x558] sm:$0xf0]  ;;  %v3711_v34 = vor.u32 %v4455_v23, %v3708_v24 }
 0x140   : > { %2371 = vmatpush.bf16.msra.mxu3 %v3567_v11  ;;  %v4092_v33 = vld [vmem:[%s5205_s18 + $0x758] sm:$0xf0] }
 0x141   : > { %2333 = vmatpush.bf16.msra.mxu0 %v3167_v19  ;;  %v5759_v4 = vpop.f32.mrf.mxu0  ;;  %v3855_v19 = vor.u32 %v4491_v58, %v3852_v13  ;;  %v3692_v40 = vld [vmem:[%s5205_s18 + $0x438] sm:$0xf0] }
 0x142   : > { %v3948_v49 = vld [vmem:[%s5205_s18 + $0x638] sm:$0xf0] }
 0x143   : > { %2346 = vmatpush.bf16.msra.mxu1 %v3295_v25  ;;  %2359 = vmatpush.bf16.msra.mxu2 %v3423_v26  ;;  %v5764_v11 = vpop.f32.mrf.mxu1  ;;  %v4487_v25 = vld [vmem:[%s5205_s18 + $0x54c] sm:$0xf]  ;;  %v3676_v57 = vld [vmem:[%s5205_s18 + $0x418] sm:$0xf0] }
 0x144   : > { %2372 = vmatpush.bf16.msra.mxu3 %v3551_v29  ;;  %2334 = vmatmul.bf16.vlgmr.msra.gmra.mxu0 %v5328_v21  ;;  %v4527_v21 = vld [vmem:[%s5205_s18 + $0x68c] sm:$0xf] }
 0x145   : > { %2378 = vmatpush.bf16.msrb.mxu0 %v3791_v30  ;;  %v3999_v8 = vor.u32 %v4527_v21, %v3996_v1  ;;  %v4519_v29 = vld [vmem:[%s5205_s18 + $0x64c] sm:$0xf]  ;;  %v3964_v30 = vld [vmem:[%s5205_s18 + $0x658] sm:$0xf0]  ;;  %v3679_v21 = vor.u32 %v4447_v56, %v3676_v57 }
 0x146   : > { %2360 = vmatmul.bf16.vlgmr.msra.gmra.mxu2 %v5314_v5  ;;  %2347 = vmatmul.bf16.vlgmr.msra.gmra.mxu1 %v5331_v22  ;;  %v3887_v5 = vor.u32 %v4499_v51, %v3884_v54  ;;  %v3743_v22 = vor.u32 %v4463_v61, %v3740_v62  ;;  %v3967_v37 = vor.u32 %v4519_v29, %v3964_v30  ;;  %v4076_v51 = vld [vmem:[%s5205_s18 + $0x738] sm:$0xf0]  ;;  %v4511_v61 = vld [vmem:[%s5205_s18 + $0x60c] sm:$0xf] }
 0x147   : > { %2391 = vmatpush.bf16.msrb.mxu1 %v3919_v31  ;;  %2404 = vmatpush.bf16.msrb.mxu2 %v4047_v32  ;;  %v4551_v32 = vld [vmem:[%s5205_s18 + $0x74c] sm:$0xf]  ;;  %v3932_v62 = vld [vmem:[%s5205_s18 + $0x618] sm:$0xf0] }
 0x148   : > { %2417 = vmatpush.bf16.msrb.mxu3 %v4175_v36  ;;  %v3839_v36 = vor.u32 %v4487_v25, %v3836_v28  ;;  %v3935_v2 = vor.u32 %v4511_v61, %v3932_v62 }
 0x149   : > { %2373 = vmatmul.bf16.vlgmr.msra.gmra.mxu3 %v5317_v7  ;;  %2379 = vmatpush.bf16.msrb.mxu0 %v3775_v44  ;;  %v4495_v7 = vld [vmem:[%s5205_s18 + $0x58c] sm:$0xf]  ;;  %v2153_v26 = vpop.f32.mrf.mxu2  ;;  %v2129_v35 = vpop.f32.mrf.mxu0  ;;  %v4095_v44 = vor.u32 %v4551_v32, %v4092_v33 }
 0x14a   : > { %v3871_v6 = vor.u32 %v4495_v7, %v3868_v0  ;;  %v4060_v0 = vld [vmem:[%s5205_s18 + $0x718] sm:$0xf0] }
 0x14b   : > { %2392 = vmatpush.bf16.msrb.mxu1 %v3903_v47  ;;  %2405 = vmatpush.bf16.msrb.mxu2 %v4031_v48  ;;  %v2142_v46 = vpop.f32.mrf.mxu1  ;;  %v3820_v47 = vld [vmem:[%s5205_s18 + $0x538] sm:$0xf0]  ;;  %v4515_v48 = vld [vmem:[%s5205_s18 + $0x62c] sm:$0xf] }
 0x14c   : > { %2418 = vmatpush.bf16.msrb.mxu3 %v4159_v52  ;;  %v2166_v31 = vpop.f32.mrf.mxu3  ;;  %v3695_v52 = vor.u32 %v4451_v38, %v3692_v40  ;;  %v3823_v54 = vor.u32 %v4483_v41, %v3820_v47  ;;  %v3951_v55 = vor.u32 %v4515_v48, %v3948_v49 }
 0x14d   : > { %2380 = vmatpush.bf16.msrb.mxu0 %v3759_v53 }
 0x14f   : > { %2393 = vmatpush.bf16.msrb.mxu1 %v3887_v5  ;;  %2406 = vmatpush.bf16.msrb.mxu2 %v4015_v60  ;;  %v4079_v5 = vor.u32 %v4547_v50, %v4076_v51  ;;  %v3804_v60 = vld [vmem:[%s5205_s18 + $0x518] sm:$0xf0] }
 0x150   : > { %2419 = vmatpush.bf16.msrb.mxu3 %v4143_v63  ;;  %v4543_v63 = vld [vmem:[%s5205_s18 + $0x70c] sm:$0xf]  ;;  %v3807_v1 = vor.u32 %v4479_v59, %v3804_v60 }
 0x151   : > { %2381 = vmatpush.bf16.msrb.mxu0 %v3743_v22  ;;  %v2155_v53 = vpop.f32.mrf.mxu2  ;;  %v4063_v3 = vor.u32 %v4543_v63, %v4060_v0  ;;  %v2141_v22 = vadd.f32 %v5764_v11, %v5759_v4 }
 0x153   : > { %2394 = vmatpush.bf16.msrb.mxu1 %v3871_v6  ;;  %2407 = vmatpush.bf16.msrb.mxu2 %v3999_v8  ;;  %v2154_v6 = vadd.f32 %v2153_v26, %v2141_v22 }
 0x154   : > { %2420 = vmatpush.bf16.msrb.mxu3 %v4127_v12  ;;  %v2168_v7 = vpop.f32.mrf.mxu3 }
 0x155   : > { %2382 = vmatpush.bf16.msrb.mxu0 %v3727_v18  ;;  %v2167_v8 = vadd.f32 %v2166_v31, %v2154_v6 }
 0x157   : > { %2395 = vmatpush.bf16.msrb.mxu1 %v3855_v19  ;;  %2408 = vmatpush.bf16.msrb.mxu2 %v3983_v20 }
 0x158   : > { %2421 = vmatpush.bf16.msrb.mxu3 %v4111_v27 }
 0x159   : > { %2383 = vmatpush.bf16.msrb.mxu0 %v3711_v34 }
 0x15b   : > { %2396 = vmatpush.bf16.msrb.mxu1 %v3839_v36  ;;  %2409 = vmatpush.bf16.msrb.mxu2 %v3967_v37  ;;  %v444_v37 = vld [vmem:[#allocation2 + $0x18] sm:$0xff] }
 0x15c   : > { %2422 = vmatpush.bf16.msrb.mxu3 %v4095_v44 }
 0x15d   : > { %2384 = vmatpush.bf16.msrb.mxu0 %v3695_v52 }
 0x15f   : > { %2397 = vmatpush.bf16.msrb.mxu1 %v3823_v54  ;;  %2410 = vmatpush.bf16.msrb.mxu2 %v3951_v55 }
 0x160   : > { %2423 = vmatpush.bf16.msrb.mxu3 %v4079_v5 }
 0x161   : > { %2385 = vmatpush.bf16.msrb.mxu0 %v3679_v21  ;;  %v2179_v9 = vpop.f32.mrf.mxu0 }
 0x162   : > { %v2180_v10 = vadd.f32 %v2179_v9, %v2167_v8 }
 0x163   : > { %2398 = vmatpush.bf16.msrb.mxu1 %v3807_v1  ;;  %2411 = vmatpush.bf16.msrb.mxu2 %v3935_v2  ;;  %v2192_v58 = vpop.f32.mrf.mxu1  ;;  %v445_v1 = vld [vmem:[#allocation2 + $0x8] sm:$0xff] }
 0x164   : > { %2424 = vmatpush.bf16.msrb.mxu3 %v4063_v3  ;;  %2386 = vmatmul.bf16.vlgmr.msrb.gmra.mxu0 %v5387_v42  ;;  %v2193_v12 = vadd.f32 %v2192_v58, %v2180_v10 }
 0x166   : > { %2399 = vmatmul.bf16.vlgmr.msrb.gmra.mxu1 %v5391_v45  ;;  %2412 = vmatmul.bf16.vlgmr.msrb.gmra.mxu2 %v5383_v39 }
 0x167   : > { %2425 = vmatmul.bf16.vlgmr.msrb.gmra.mxu3 %v5389_v43 }
 0x169   : > { %v2205_v13 = vpop.f32.mrf.mxu2  ;;  %v2181_v16 = vpop.f32.mrf.mxu0 }
 0x16a   : > { %v2206_v4 = vadd.f32 %v2205_v13, %v2193_v12 }
 0x16b   : > { %v2194_v17 = vpop.f32.mrf.mxu1 }
 0x16c   : > { %v2218_v11 = vpop.f32.mrf.mxu3 }
 0x16d   : > { %v2219_v15 = vadd.f32 %v2218_v11, %v2206_v4 }
 0x16f   : > { %v2431_v42 = vadd.f32 %v2219_v15, %v443_v14 }
 0x171   : > { %2435 = vst [vmem:[#allocation2] sm:$0xff] %v2431_v42  ;;  %v2207_v18 = vpop.f32.mrf.mxu2 }
 0x174   : > { %v2220_v45 = vpop.f32.mrf.mxu3 }
 0x181   : > { %v2231_v19 = vpop.f32.mrf.mxu0 }
 0x183   : > { %v2244_v39 = vpop.f32.mrf.mxu1 }
 0x184   : > { %v2245_v27 = vadd.f32 %v2244_v39, %v2231_v19 }
 0x189   : > { %v2257_v20 = vpop.f32.mrf.mxu2  ;;  %v2233_v23 = vpop.f32.mrf.mxu0 }
 0x18a   : > { %v2258_v28 = vadd.f32 %v2257_v20, %v2245_v27 }
 0x18b   : > { %v2246_v24 = vpop.f32.mrf.mxu1 }
 0x18c   : > { %v2270_v43 = vpop.f32.mrf.mxu3 }
 0x18d   : > { %v2271_v29 = vadd.f32 %v2270_v43, %v2258_v28 }
 0x191   : > { %v2259_v25 = vpop.f32.mrf.mxu2 }
 0x194   : > { %v2272_v26 = vpop.f32.mrf.mxu3 }
 0x1a1   : > { %v2283_v30 = vpop.f32.mrf.mxu0 }
 0x1a2   : > { %v2284_v31 = vadd.f32 %v2283_v30, %v2271_v29 }
 0x1a3   : > { %v2296_v32 = vpop.f32.mrf.mxu1 }
 0x1a4   : > { %v2297_v33 = vadd.f32 %v2296_v32, %v2284_v31 }
 0x1a9   : > { %v2309_v34 = vpop.f32.mrf.mxu2  ;;  %v2285_v40 = vpop.f32.mrf.mxu0 }
 0x1aa   : > { %v2310_v35 = vadd.f32 %v2309_v34, %v2297_v33 }
 0x1ab   : > { %v2298_v41 = vpop.f32.mrf.mxu1 }
 0x1ac   : > { %v2322_v36 = vpop.f32.mrf.mxu3 }
 0x1ad   : > { %v2323_v38 = vadd.f32 %v2322_v36, %v2310_v35 }
 0x1af   : > { %v2432_v46 = vadd.f32 %v2323_v38, %v444_v37 }
 0x1b1   : > { %2436 = vst [vmem:[#allocation2 + $0x18] sm:$0xff] %v2432_v46  ;;  %v2311_v44 = vpop.f32.mrf.mxu2 }
 0x1b4   : > { %v2324_v47 = vpop.f32.mrf.mxu3 }
 0x1c1   : > { %v2335_v48 = vpop.f32.mrf.mxu0 }
 0x1c3   : > { %v2348_v49 = vpop.f32.mrf.mxu1 }
 0x1c4   : > { %v2349_v57 = vadd.f32 %v2348_v49, %v2335_v48 }
 0x1c9   : > { %v2361_v50 = vpop.f32.mrf.mxu2  ;;  %v2337_v52 = vpop.f32.mrf.mxu0 }
 0x1ca   : > { %v2362_v59 = vadd.f32 %v2361_v50, %v2349_v57 }
 0x1cb   : > { %v2350_v54 = vpop.f32.mrf.mxu1 }
 0x1cc   : > { %v2374_v51 = vpop.f32.mrf.mxu3 }
 0x1cd   : > { %v2375_v53 = vadd.f32 %v2374_v51, %v2362_v59 }
 0x1d1   : > { %v2363_v55 = vpop.f32.mrf.mxu2 }
 0x1d4   : > { %v2376_v56 = vpop.f32.mrf.mxu3 }
 0x1e1   : > { %v2387_v5 = vpop.f32.mrf.mxu0 }
 0x1e2   : > { %v2388_v61 = vadd.f32 %v2387_v5, %v2375_v53 }
 0x1e3   : > { %v2400_v60 = vpop.f32.mrf.mxu1 }
 0x1e4   : > { %v2401_v62 = vadd.f32 %v2400_v60, %v2388_v61 }
 0x1e9   : > { %v2413_v7 = vpop.f32.mrf.mxu2  ;;  %v2389_v21 = vpop.f32.mrf.mxu0 }
 0x1ea   : > { %v2414_v63 = vadd.f32 %v2413_v7, %v2401_v62  ;;  %v2426_v0 = vpop.f32.mrf.mxu3 }
 0x1eb   : > { %v2402_v2 = vpop.f32.mrf.mxu1 }
 0x1ec   : > { %v2427_v3 = vadd.f32 %v2426_v0, %v2414_v63 }
 0x1ee   : > { %v2433_v22 = vadd.f32 %v2427_v3, %v445_v1  ;;  %2441 = sbr.rel (%p4176_p1) target bundleno = 1189 (0x4a5), region = 88 }
 0x1f0   : > { %2437 = vst [vmem:[#allocation2 + $0x8] sm:$0xff] %v2433_v22 }
 0x1f1   : > { %v2415_v6 = vpop.f32.mrf.mxu2 }
 0x1f2   : > { %v2428_v8 = vpop.f32.mrf.mxu3 }
 0x1f3   : > { %v4581_v9 = vld [vmem:[#allocation11 + $0x38] sm:$0xff]  ;;  %v4580_v13 = vld [vmem:[#allocation11 + $0x30] sm:$0xff]  ;;  %v4579_v15 = vld [vmem:[#allocation11 + $0x28] sm:$0xff]  ;;  %vm2566_vm12 = vcmask 1040384   ;;  %vm2568_vm13 = vcmask 1042434   ;;  %vm2570_vm14 = vcmask 1041408  }
 0x1f4   : > { %v4589_v10 = vld [vmem:[#allocation11 + $0x78] sm:$0xff]  ;;  %2869 = vmatpush.bf16.msra.mxu0 %v4581_v9  ;;  %v4588_v4 = vld [vmem:[#allocation11 + $0x70] sm:$0xff]  ;;  %v4587_v16 = vld [vmem:[#allocation11 + $0x68] sm:$0xff] }
 0x1f5   : > { %v4597_v58 = vld [vmem:[#allocation11 + $0xb8] sm:$0xff]  ;;  %2882 = vmatpush.bf16.msra.mxu1 %v4589_v10  ;;  %v4596_v11 = vld [vmem:[#allocation11 + $0xb0] sm:$0xff]  ;;  %v4595_v17 = vld [vmem:[#allocation11 + $0xa8] sm:$0xff] }
 0x1f6   : > { %v4605_v12 = vld [vmem:[#allocation11 + $0xf8] sm:$0xff]  ;;  %2895 = vmatpush.bf16.msra.mxu2 %v4597_v58  ;;  %v4604_v14 = vld [vmem:[#allocation11 + $0xf0] sm:$0xff]  ;;  %v4603_v42 = vld [vmem:[#allocation11 + $0xe8] sm:$0xff] }
 0x1f7   : > { %2908 = vmatpush.bf16.msra.mxu3 %v4605_v12  ;;  %v4578_v18 = vld [vmem:[#allocation11 + $0x20] sm:$0xff]  ;;  %v2442_v20 = vld [vmem:[#allocation2 + $0x10] sm:$0xff]  ;;  %v2443_v43 = vld [vmem:[#allocation2] sm:$0xff] }
 0x1f8   : > { %2870 = vmatpush.bf16.msra.mxu0 %v4580_v13  ;;  %v4586_v45 = vld [vmem:[#allocation11 + $0x60] sm:$0xff]  ;;  %v2444_v23 = vld [vmem:[#allocation2 + $0x18] sm:$0xff]  ;;  %v2446_v25 = vrot.slane %v2442_v20, 4  ;;  %v2452_v26 = vrot.slane %v2443_v43, 4  ;;  %v4577_v30 = vld [vmem:[#allocation11 + $0x18] sm:$0xff] }
 0x1f9   : > { %2883 = vmatpush.bf16.msra.mxu1 %v4588_v4  ;;  %v4594_v19 = vld [vmem:[#allocation11 + $0xa0] sm:$0xff]  ;;  %v2458_v27 = vrot.slane %v2444_v23, 4  ;;  %v4585_v31 = vld [vmem:[#allocation11 + $0x58] sm:$0xff]  ;;  %v4576_v44 = vld [vmem:[#allocation11 + $0x10] sm:$0xff] }
 0x1fa   : > { %2896 = vmatpush.bf16.msra.mxu2 %v4596_v11  ;;  %v4602_v39 = vld [vmem:[#allocation11 + $0xe0] sm:$0xff]  ;;  %v2447_v29 = vadd.f32 %v2446_v25, %v2442_v20  ;;  %v2453_v32 = vadd.f32 %v2452_v26, %v2443_v43  ;;  %v4593_v35 = vld [vmem:[#allocation11 + $0x98] sm:$0xff]  ;;  %v4584_v47 = vld [vmem:[#allocation11 + $0x50] sm:$0xff] }
 0x1fb   : > { %2909 = vmatpush.bf16.msra.mxu3 %v4604_v14  ;;  %v2445_v24 = vld [vmem:[#allocation2 + $0x8] sm:$0xff]  ;;  %v2459_v33 = vadd.f32 %v2458_v27, %v2444_v23  ;;  %v4601_v36 = vld [vmem:[#allocation11 + $0xd8] sm:$0xff]  ;;  %v4592_v51 = vld [vmem:[#allocation11 + $0x90] sm:$0xff] }
 0x1fc   : > { %2871 = vmatpush.bf16.msra.mxu0 %v4579_v15  ;;  %v2464_v28 = vrot.slane %v2445_v24, 4  ;;  %v2448_v37 = vrot.slane %v2447_v29, 2  ;;  %v2454_v38 = vrot.slane %v2453_v32, 2  ;;  %v4600_v52 = vld [vmem:[#allocation11 + $0xd0] sm:$0xff]  ;;  %v4575_v53 = vld [vmem:[#allocation11 + $0x8] sm:$0xff]  ;;  %v4574_v22 = vld [vmem:[#allocation11] sm:$0xff] }
 0x1fd   : > { %2884 = vmatpush.bf16.msra.mxu1 %v4587_v16  ;;  %v2460_v40 = vrot.slane %v2459_v33, 2  ;;  %v4583_v5 = vld [vmem:[#allocation11 + $0x48] sm:$0xff]  ;;  %v4582_v6 = vld [vmem:[#allocation11 + $0x40] sm:$0xff] }
 0x1fe   : > { %2897 = vmatpush.bf16.msra.mxu2 %v4595_v17  ;;  %v2465_v34 = vadd.f32 %v2464_v28, %v2445_v24  ;;  %v2449_v46 = vadd.f32 %v2448_v37, %v2447_v29  ;;  %v2455_v48 = vadd.f32 %v2454_v38, %v2453_v32  ;;  %v4591_v7 = vld [vmem:[#allocation11 + $0x88] sm:$0xff]  ;;  %v4590_v58 = vld [vmem:[#allocation11 + $0x80] sm:$0xff] }
 0x1ff   : > { %2910 = vmatpush.bf16.msra.mxu3 %v4603_v42  ;;  %v2461_v49 = vadd.f32 %v2460_v40, %v2459_v33  ;;  %v4599_v63 = vld [vmem:[#allocation11 + $0xc8] sm:$0xff]  ;;  %v4598_v12 = vld [vmem:[#allocation11 + $0xc0] sm:$0xff] }
 0x200   : > { %2872 = vmatpush.bf16.msra.mxu0 %v4578_v18  ;;  %v2466_v41 = vrot.slane %v2465_v34, 2  ;;  %v2450_v54 = vrot.slane %v2449_v46, 1  ;;  %v2456_v55 = vrot.slane %v2455_v48, 1 }
 0x201   : > { %2885 = vmatpush.bf16.msra.mxu1 %v4586_v45  ;;  %v2462_v56 = vrot.slane %v2461_v49, 1 }
 0x202   : > { %2898 = vmatpush.bf16.msra.mxu2 %v4594_v19  ;;  %v2467_v50 = vadd.f32 %v2466_v41, %v2465_v34  ;;  %v2451_v59 = vadd.f32 %v2450_v54, %v2449_v46  ;;  %v2457_v60 = vadd.f32 %v2456_v55, %v2455_v48  ;;  %v4606_v55 = vld [vmem:[#allocation14] sm:$0xff] }
 0x203   : > { %2911 = vmatpush.bf16.msra.mxu3 %v4602_v39  ;;  %v2463_v61 = vadd.f32 %v2462_v56, %v2461_v49 }
 0x204   : > { %2873 = vmatpush.bf16.msra.mxu0 %v4577_v30  ;;  %v2468_v57 = vrot.slane %v2467_v50, 1  ;;  %v2470_v0 = vmul.f32 0.125, %v2451_v59  ;;  %v2471_v21 = vmul.f32 0.125, %v2457_v60 }
 0x205   : > { %2886 = vmatpush.bf16.msra.mxu1 %v4585_v31  ;;  %v2472_v1 = vmul.f32 0.125, %v2463_v61 }
 0x206   : > { %2899 = vmatpush.bf16.msra.mxu2 %v4593_v35  ;;  %v2469_v62 = vadd.f32 %v2468_v57, %v2467_v50  ;;  %v5802_v3 = vsub.f32 %v2442_v20, %v2470_v0  ;;  %v5804_v8 = vsub.f32 %v2443_v43, %v2471_v21 }
 0x207   : > { %2912 = vmatpush.bf16.msra.mxu3 %v4601_v36  ;;  %v5806_v9 = vsub.f32 %v2444_v23, %v2472_v1 }
 0x208   : > { %2874 = vmatpush.bf16.msra.mxu0 %v4576_v44  ;;  %v2473_v2 = vmul.f32 0.125, %v2469_v62  ;;  %v2478_v13 = vmul.f32 %v5802_v3, %v5802_v3  ;;  %v2479_v4 = vmul.f32 %v5804_v8, %v5804_v8 }
 0x209   : > { %2887 = vmatpush.bf16.msra.mxu1 %v4584_v47  ;;  %v2480_v11 = vmul.f32 %v5806_v9, %v5806_v9 }
 0x20a   : > { %2900 = vmatpush.bf16.msra.mxu2 %v4592_v51  ;;  %v5808_v10 = vsub.f32 %v2445_v24, %v2473_v2  ;;  %v2482_v15 = vrot.slane %v2478_v13, 4  ;;  %v2488_v16 = vrot.slane %v2479_v4, 4 }
 0x20b   : > { %2913 = vmatpush.bf16.msra.mxu3 %v4600_v52  ;;  %v2494_v17 = vrot.slane %v2480_v11, 4 }
 0x20c   : > { %2875 = vmatpush.bf16.msra.mxu0 %v4575_v53  ;;  %v2481_v14 = vmul.f32 %v5808_v10, %v5808_v10  ;;  %v2483_v18 = vadd.f32 %v2482_v15, %v2478_v13  ;;  %v2489_v45 = vadd.f32 %v2488_v16, %v2479_v4 }
 0x20d   : > { %2888 = vmatpush.bf16.msra.mxu1 %v4583_v5  ;;  %v2495_v19 = vadd.f32 %v2494_v17, %v2480_v11 }
 0x20e   : > { %2901 = vmatpush.bf16.msra.mxu2 %v4591_v7  ;;  %v2500_v42 = vrot.slane %v2481_v14, 4  ;;  %v2484_v20 = vrot.slane %v2483_v18, 2  ;;  %v2490_v43 = vrot.slane %v2489_v45, 2 }
 0x20f   : > { %2914 = vmatpush.bf16.msra.mxu3 %v4599_v63  ;;  %v2496_v23 = vrot.slane %v2495_v19, 2 }
 0x210   : > { %2876 = vmatpush.bf16.msra.mxu0 %v4574_v22  ;;  %v2501_v39 = vadd.f32 %v2500_v42, %v2481_v14  ;;  %v2485_v25 = vadd.f32 %v2484_v20, %v2483_v18  ;;  %v2491_v26 = vadd.f32 %v2490_v43, %v2489_v45 }
 0x211   : > { %2889 = vmatpush.bf16.msra.mxu1 %v4582_v6  ;;  %v2497_v27 = vadd.f32 %v2496_v23, %v2495_v19  ;;  %v2514_v23 = vld [vmem:[#allocation8] sm:$0xf] }
 0x212   : > { %2902 = vmatpush.bf16.msra.mxu2 %v4590_v58  ;;  %v2502_v24 = vrot.slane %v2501_v39, 2  ;;  %v2486_v29 = vrot.slane %v2485_v25, 1  ;;  %v2492_v30 = vrot.slane %v2491_v26, 1 }
 0x213   : > { %2915 = vmatpush.bf16.msra.mxu3 %v4598_v12  ;;  %v2498_v31 = vrot.slane %v2497_v27, 1 }
 0x214   : > { %v2503_v28 = vadd.f32 %v2502_v24, %v2501_v39  ;;  %v2487_v33 = vadd.f32 %v2486_v29, %v2485_v25  ;;  %v2493_v34 = vadd.f32 %v2492_v30, %v2491_v26  ;;  %2938 = vmatpush.bf16.xpose.msrb.mxu0 %v4606_v55  ;;  %v2587_v25 = vld [vmem:[#allocation9] sm:$0xf] }
 0x215   : > { %v2499_v35 = vadd.f32 %v2498_v31, %v2497_v27  ;;  %v2590_v29 = vperm.slane %v2587_v25, 1  ;;  %v2591_v30 = vperm.slane %v2587_v25, 2  ;;  %v2592_v31 = vperm.slane %v2587_v25, 3 }
 0x216   : > { %v2504_v32 = vrot.slane %v2503_v28, 1  ;;  %v2506_v37 = vmul.f32 0.125, %v2487_v33  ;;  %v2507_v38 = vmul.f32 0.125, %v2493_v34 }
 0x217   : > { %v2508_v40 = vmul.f32 0.125, %v2499_v35 }
 0x218   : > { %v2505_v36 = vadd.f32 %v2504_v32, %v2503_v28  ;;  %v2510_v46 = vmax.f32 %v2506_v37, 0.0  ;;  %v2511_v44 = vmax.f32 %v2507_v38, 0.0  ;;  %v2589_v28 = vperm.slane %v2587_v25, 0 }
 0x219   : > { %v2512_v47 = vmax.f32 %v2508_v40, 0.0 }
 0x21a   : > { %v2509_v41 = vmul.f32 0.125, %v2505_v36  ;;  %v2515_v49 = vadd.f32 1e-05, %v2510_v46  ;;  %v2516_v50 = vadd.f32 1e-05, %v2511_v44 }
 0x21b   : > { %v2517_v51 = vadd.f32 1e-05, %v2512_v47 }
 0x21c   : > { %v2513_v48 = vmax.f32 %v2509_v41, 0.0  ;;  %4720 = vrsqrt.f32 %v2515_v49  ;;  %vm2525_vm0 = vweird.f32 %v2515_v49  ;;  %vm2535_vm2 = vweird.f32 %v2516_v50 }
 0x21d   : > { %4722 = vrsqrt.f32 %v2516_v50  ;;  %vm2545_vm4 = vweird.f32 %v2517_v51 }
 0x21e   : > { %v2518_v52 = vadd.f32 1e-05, %v2513_v48  ;;  %4724 = vrsqrt.f32 %v2517_v51 }
 0x220   : > { %4726 = vrsqrt.f32 %v2518_v52  ;;  %vm2555_vm7 = vweird.f32 %v2518_v52 }
 0x222   : > { %v4721_v54 = vpop.eup %4720 }
 0x223   : > { %v4723_v56 = vpop.eup %4722  ;;  %v2520_v57 = vmul.f32 %v4721_v54, %v2515_v49  ;;  %vm2526_vm1 = vweird.f32 %v4721_v54 }
 0x224   : > { %v4725_v59 = vpop.eup %4724  ;;  %v2530_v53 = vmul.f32 %v4723_v56, %v2516_v50  ;;  %vm2536_vm3 = vweird.f32 %v4723_v56  ;;  %vm5818_vm6 = vmor %vm2525_vm0, %vm2526_vm1  ;;  %vm2958_vm0 = vcmask 130048  }
 0x225   : > { %v2521_v60 = vmul.f32 %v4721_v54, %v2520_v57  ;;  %v2540_v61 = vmul.f32 %v4725_v59, %v2517_v51  ;;  %vm2546_vm5 = vweird.f32 %v4725_v59  ;;  %vm2537_vm9 = vmor %vm2535_vm2, %vm2536_vm3 }
 0x226   : > { %v4727_v5 = vpop.eup %4726  ;;  %v2531_v62 = vmul.f32 %v4723_v56, %v2530_v53  ;;  %vm2547_vm10 = vmor %vm2545_vm4, %vm2546_vm5  ;;  %vm2985_vm5 = vcmask 7168  }
 0x227   : > { %v2550_v7 = vmul.f32 %v4727_v5, %v2518_v52  ;;  %v2522_v63 = vmul.f32 0.5, %v2521_v60  ;;  %v2541_v0 = vmul.f32 %v4725_v59, %v2540_v61  ;;  %vm2556_vm8 = vweird.f32 %v4727_v5 }
 0x228   : > { %v2532_v21 = vmul.f32 0.5, %v2531_v62  ;;  %vm2557_vm11 = vmor %vm2555_vm7, %vm2556_vm8 }
 0x229   : > { %v2551_v1 = vmul.f32 %v4727_v5, %v2550_v7  ;;  %v2523_v2 = vsub.f32 1.5, %v2522_v63  ;;  %v2542_v22 = vmul.f32 0.5, %v2541_v0 }
 0x22a   : > { %v2533_v58 = vsub.f32 1.5, %v2532_v21 }
 0x22b   : > { %v2552_v12 = vmul.f32 0.5, %v2551_v1  ;;  %v2524_v13 = vmul.f32 %v4721_v54, %v2523_v2  ;;  %v2543_v4 = vsub.f32 1.5, %v2542_v22  ;;  %v2948_v22 = vlaneseq }
 0x22c   : > { %v2534_v11 = vmul.f32 %v4723_v56, %v2533_v58 }
 0x22d   : > { %v2553_v14 = vsub.f32 1.5, %v2552_v12  ;;  %v2544_v15 = vmul.f32 %v4725_v59, %v2543_v4  ;;  %v2528_v16 = vsel %vm5818_vm6, %v4721_v54, %v2524_v13  ;;  %v2949_v12 = vand.u32 127, %v2948_v22 }
 0x22e   : > { %v2538_v17 = vsel %vm2537_vm9, %v4723_v56, %v2534_v11 }
 0x22f   : > { %v2554_v42 = vmul.f32 %v4727_v5, %v2553_v14  ;;  %v2548_v18 = vsel %vm2547_vm10, %v4725_v59, %v2544_v15  ;;  %v2563_v45 = vrot.slane %v2538_v17, 7  ;;  %v5025_v14 = vmov 0.0  }
 0x230   : > { %v2564_v39 = vrot.slane %v2548_v18, 6 }
 0x231   : > { %v2558_v19 = vsel %vm2557_vm11, %v4727_v5, %v2554_v42  ;;  %v2567_v43 = vsel %vm2566_vm12, %v2528_v16, %v2563_v45 }
 0x232   : > { %v2565_v20 = vrot.slane %v2558_v19, 5 }
 0x234   : > { %v2569_v24 = vsel %vm2568_vm13, %v2564_v39, %v2565_v20 }
 0x235   : > { %v2571_v26 = vsel %vm2570_vm14, %v2567_v43, %v2569_v24 }
 0x236   : > { %v2573_v27 = vmul.f32 %v2571_v26, %v2514_v23 }
 0x238   : > { %v2575_v32 = vperm.slane %v2573_v27, 0  ;;  %v2576_v33 = vperm.slane %v2573_v27, 1  ;;  %v2577_v34 = vperm.slane %v2573_v27, 2  ;;  %v2578_v35 = vperm.slane %v2573_v27, 3 }
 0x23a   : > { %v2583_v36 = vmul.f32 %v2575_v32, %v5802_v3  ;;  %v2584_v37 = vmul.f32 %v2576_v33, %v5804_v8  ;;  %v2585_v38 = vmul.f32 %v2577_v34, %v5806_v9  ;;  %v2586_v40 = vmul.f32 %v2578_v35, %v5808_v10  ;;  %v2950_v3 = vld [vmem:[%s5855_s7] sm:$0xff]  ;;  %v4719_v9 = vld [vmem:[#allocation12] ss:$0 sm:$0xff] }
 0x23b   : > { %v5024_v8 = vmov 0  }
 0x23c   : > { %v2597_v41 = vadd.f32 %v2589_v28, %v2583_v36  ;;  %v2598_v46 = vadd.f32 %v2590_v29, %v2584_v37  ;;  %v2599_v44 = vadd.f32 %v2591_v30, %v2585_v38  ;;  %v2600_v47 = vadd.f32 %v2592_v31, %v2586_v40  ;;  %4718 = vset.pattern.permute.xlu0 %v5024_v8 }
 0x23d   : > { %2952 = vperm.xlu0 %4718, %v2950_v3  }
 0x23e   : > { %v2601_v48 = vmax.f32 %v2597_v41, 0.0  ;;  %v2602_v49 = vmax.f32 %v2598_v46, 0.0  ;;  %v2603_v50 = vmax.f32 %v2599_v44, 0.0  ;;  %v2604_v51 = vmax.f32 %v2600_v47, 0.0 }
 0x240   : > { %v2605_v52 = vpack.c.bf16 %v2601_v48, %v2601_v48  ;;  %v2606_v54 = vpack.c.bf16 %v2602_v49, %v2602_v49  ;;  %v2607_v55 = vpack.c.bf16 %v2603_v50, %v2603_v50  ;;  %v2608_v56 = vpack.c.bf16 %v2604_v51, %v2604_v51 }
 0x242   : > { %2877 = vmatmul.bf16.vlgmr.msra.gmra.mxu0 %v2605_v52  ;;  %2890 = vmatmul.bf16.vlgmr.msra.gmra.mxu1 %v2606_v54 }
 0x243   : > { %2903 = vmatmul.bf16.vlgmr.msra.gmra.mxu2 %v2607_v55  ;;  %2916 = vmatmul.bf16.vlgmr.msra.gmra.mxu3 %v2608_v56 }
 0x2af   : > { %v2953_v4 = vpop.permute.xlu0 %2952 }
 0x2b0   : > { %vm2954_vm15 = vcmp.eq.s32.totalorder %v2949_v12, %v2953_v4 }
 0x2b1   : > { %v4310_v15 = vsel %vm2954_vm15, 1.0, %v5025_v14 }
 0x2bf   : > { %v2878_v10 = vpop.f32.mrf.mxu0  ;;  %v2891_v57 = vpop.f32.mrf.mxu1 }
 0x2c0   : > { %v2879_v59 = vadd.f32 %v4719_v9, %v2878_v10 }
 0x2c2   : > { %v2892_v53 = vadd.f32 %v2891_v57, %v2879_v59 }
 0x2c6   : > { %v2904_v5 = vpop.f32.mrf.mxu2  ;;  %v2917_v60 = vpop.f32.mrf.mxu3 }
 0x2c7   : > { %v2905_v61 = vadd.f32 %v2904_v5, %v2892_v53  ;;  %v2880_v62 = vpop.f32.mrf.mxu0  ;;  %v2893_v7 = vpop.f32.mrf.mxu1 }
 0x2c9   : > { %v2918_v63 = vadd.f32 %v2917_v60, %v2905_v61 }
 0x2cb   : > { %v2921_v0 = vmul.f32 2.0, %v2918_v63 }
 0x2cd   : > { %v2922_v21 = vpack.c.bf16 %v2921_v0, %v2921_v0 }
 0x2ce   : > { %v2906_v1 = vpop.f32.mrf.mxu2  ;;  %v2919_v2 = vpop.f32.mrf.mxu3 }
 0x2cf   : > { %2939 = vmatmul.bf16.vlgmr.msrb.gmra.mxu0 %v2922_v21 }
 0x34c   : > { %v2940_v6 = vpop.f32.mrf.mxu0 }
 0x34d   : > { %v4309_v58 = vclamps-f32 %v2940_v6, 20.0 }
 0x34f   : > { %v2946_v13 = vmul.f32 1.442695, %v4309_v58 }
 0x351   : > { %4728 = vpow2.f32 %v2946_v13 }
 0x354   : > { %v2942_v11 = vpop.f32.mrf.mxu0 }
 0x357   : > { %v4729_v16 = vpop.eup %4728 }
 0x358   : > { %v2962_v17 = vsel %vm2958_vm0, %v4729_v16, 0.0  ;;  %v2957_v42 = vmul.f32 %v4729_v16, %v4310_v15 }
 0x359   : > { %2963 = vadd.xlane.f32.xlu0 %v2962_v17 }
 0x35a   : > { %v2959_v18 = vsel %vm2958_vm0, %v2957_v42, 0.0 }
 0x35b   : > { %2960 = vadd.xlane.f32.xlu1 %v2959_v18 }
 0x3cc   : > { %v2964_v45 = vpop.xlane.xlu0 %2963 }
 0x3cd   : > { %v2966_v19 = vadd.f32 1e-08, %v2964_v45 }
 0x3ce   : > { %v2961_v26 = vpop.xlane.xlu1 %2960 }
 0x3cf   : > { %4730 = vrcp.f32 %v2966_v19  ;;  %v2978_v23 = vand.u32 2147483648, %v2966_v19  ;;  %v2976_v25 = vand.u32 2147483647, %v2966_v19  ;;  %vm2972_vm2 = vweird.f32 %v2966_v19 }
 0x3d0   : > { %v2965_v30 = vadd.f32 1e-08, %v2961_v26 }
 0x3d1   : > { %v2979_v28 = vor.u32 1.1754944e-38, %v2978_v23  ;;  %vm2977_vm4 = vcmp.eq.f32.partialorder %v2976_v25, 8.507059e+37 }
 0x3d5   : > { %v4731_v39 = vpop.eup %4730 }
 0x3d6   : > { %v2968_v20 = vmul.f32 %v4731_v39, %v2966_v19  ;;  %vm2973_vm1 = vweird.f32 %v4731_v39 }
 0x3d7   : > { %vm2974_vm3 = vmor %vm2972_vm2, %vm2973_vm1 }
 0x3d8   : > { %v2969_v43 = vsub.f32 1.0, %v2968_v20 }
 0x3da   : > { %v2970_v24 = vmul.f32 %v4731_v39, %v2969_v43 }
 0x3dc   : > { %v2971_v27 = vadd.f32 %v4731_v39, %v2970_v24 }
 0x3de   : > { %v2975_v29 = vsel %vm2974_vm3, %v4731_v39, %v2971_v27 }
 0x3df   : > { %v2980_v31 = vsel %vm2977_vm4, %v2979_v28, %v2975_v29 }
 0x3e0   : > { %v2981_v32 = vmul.f32 %v2980_v31, %v2965_v30 }
 0x3e2   : > { %v2982_v33 = vadd.f32 1e-08, %v2981_v32 }
 0x3e4   : > { %4732 = vlog2.f32 %v2982_v33 }
 0x3ea   : > { %v4733_v34 = vpop.eup %4732 }
 0x3eb   : > { %v2984_v35 = vmul.f32 0.6931472, %v4733_v34 }
 0x3ed   : > { %v2986_v36 = vsel %vm2985_vm5, %v2984_v35, 0.0 }
 0x3ee   : > { %2987 = vadd.xlane.f32.xlu1 %v2986_v36 }
 0x461   : > { %v2988_v37 = vpop.xlane.xlu1 %2987 }
 0x462   : > { %v2989_v38 = vrot.slane %v2988_v37, 4 }
 0x464   : > { %v2990_v40 = vadd.f32 %v2989_v38, %v2988_v37 }
 0x466   : > { %v2991_v41 = vrot.slane %v2990_v40, 2 }
 0x468   : > { %v2992_v46 = vadd.f32 %v2991_v41, %v2990_v40 }
 0x46a   : > { %v2993_v44 = vrot.slane %v2992_v46, 1 }
 0x46c   : > { %v2994_v47 = vadd.f32 %v2993_v44, %v2992_v46 }
 0x46e   : > { %4607 = vpush %v2994_v47 }
 0x49f   : > { %s4608_s16 = spop %4607 }
 0x4a0   : > { %s2996_s26 = ssub.f32 0.0, %s4608_s16 }
 0x4a2   : > { %s2997_s2 = smul.f32 0.125, %s2996_s26 }
 0x4a4   : > { %2999 = sst [smem:[#allocation15]] %s2997_s2 }
 0x4a5 PF: > { %p4671_p3 = scmp.eq.s32.totalorder %s5096_s12, 1  ;;  %s3006_s27 = sshll.u32 %s5856_s8, 4  ;;  %s3007_s27 = int_to_ptr.hbm [resolvable:$true] %s3006_s27 }
 0x4a6   : > { %s5026_s22 = smov [#allocation15]  }
 0x4a7   : > { %4634 = dma.smem_to_hbm (%p4671_p3), %s5026_s22, 16, %s3007_s27, [#allocation5]  }
 0x4a8   : > { %4995 = dma.done.wait (%p4671_p3), [#allocation5], 16  }
 0x4a9   : > { %4997 = vsyncadd (%p4671_p3), [#allocation5], 4294967280 }
 0x4aa   : > { %3015 = sfence }
 0x4ab PF: > { %p24_p4 = scmp.ge.s32.totalorder %s5137_s24, 4   ;;  %s5871_s27 = smov %s5004_s28 }
 0x4ac   : > { %s5872_s28 = smov %s5008_s29  ;;  %s5873_s29 = smov %s5148_s9 }
 0x4ad   : > { %s5874_s30 = smov %s5137_s24  ;;  %26 = sbr.rel (!%p24_p4) target bundleno = 13 (0xd), region = 131 }
 0x4b2   :  { %3021 = vsyncpa [#allocation4], 1 }
 0x4b3   :  { %3023 = vsyncpa [#allocation4 + $0x1], 1 }
 0x4b4   :  { %3024 = vsyncpa [#allocation7], 1 }
 0x4b5   :  { %3026 = vsyncpa [#allocation7 + $0x1], 1 }
 0x4b6   :  { %3027 = vsyncpa [#allocation10], 1 }
 0x4b7   :  { %3028 = vsyncpa [#allocation13], 1 }
 0x4b8   :  { %3029 = vsyncpa [#allocation5], 1 }
 0x4b9   :  { %3031 = vsyncpa [#allocation5 + $0x1], 1 }

</bundles_post_ra>
